<compile_context>
chip_gen: v7x
topology: tpu7x:2x2x1
jax: 0.10.0
libtpu: 0.0.40
codegen_flags: <defaults>
</compile_context>

<pallas_src>
import functools

import jax
import jax.numpy as jnp
from jax.experimental import pallas as pl
from jax.experimental.pallas import tpu as pltpu

# ----------------------- small, module-consistent sizes -----------------------
NUM_WORDS, WORD_DIM = 50, 16
NUM_CHARS, CHAR_DIM = 30, 8
NUM_POS, POS_DIM = 12, 8
HIDDEN = 32            # hidden_size (per direction)
NUM_LABELS = 5
ARC_SPACE = 32
TYPE_SPACE = 16
B, L, CLEN = 2, 8, 6   # batch, sentence length, char length
DIM_ENC = WORD_DIM + CHAR_DIM + POS_DIM        # 32
OUT_DIM = 2 * HIDDEN                           # 64
HC = CHAR_DIM * 4                              # CharCNN hidden channels
WP_DIM = WORD_DIM + POS_DIM                    # merged word+pos input width (24)
GATE_COLS = 8 * HIDDEN                         # fused gate columns (i|f|o|g, each fwd||bwd)
A1 = ARC_SPACE + 1                             # augmented arc width (ones lane for biaffine)
HEAD_COLS = 2 * A1 + 2 * TYPE_SPACE            # fused head output width (98)


def _elu(x):
    # ELU(alpha=1): x if x > 0 else exp(x) - 1   (clamp avoids overflow on dead branch)
    return jnp.where(x > 0, x, jnp.exp(jnp.minimum(x, 0.0)) - 1.0)


# ----------------------------- weight slab layout -----------------------------
# Every small weight/bias lives in ONE [rows, 256] f32 slab (one input DMA); each
# section starts on an 8-row (sublane) boundary and is sliced statically in-kernel.

def _slab_layout(N):
    entries = [
        ("wih_wp2", 2 * WP_DIM, GATE_COLS),      # [word|pos] fwd rows then bwd rows
        ("wih_ch_f", CHAR_DIM, GATE_COLS),       # char -> fwd gate columns
        ("wih_ch_b", CHAR_DIM, GATE_COLS),       # char -> bwd gate columns
        ("lstm_b", 1, GATE_COLS),                # b_ih + b_hh, both directions
        ("whh_bd", 2 * HIDDEN, GATE_COLS),       # block-diagonal recurrent weight
        ("head_w", OUT_DIM, HEAD_COLS),          # [arc_h |1| arc_c |1| type_h | type_c]
        ("head_b", 1, HEAD_COLS),
        ("utilde", A1, A1),                      # [[U, q], [k^T, b]]
        ("conv1_w", 3 * CHAR_DIM, HC),           # tap k at rows k*CHAR_DIM
        ("conv1_b", 1, HC),
        ("conv2_w", 3 * HC, CHAR_DIM),           # tap k at rows k*HC
        ("conv2_b", 1, CHAR_DIM),
        ("rev", N, N),                           # time reversal within (l,b) row order
        ("perm", N, N),                          # (l,b) -> (b,l) permutation
    ]
    layout, off = {}, 0
    for name, r, c in entries:
        layout[name] = (off, r, c)
        off += -(-r // 8) * 8                    # keep every section 8-row aligned
    return layout, off, GATE_COLS


def _place_gates(w4h, direction):
    # w4h: [rows, 4H] with gate order (i, f, g, o) along columns.
    # Returns [rows, 8H] laid out gate-major as (i_f i_b | f_f f_b | o_f o_b | g_f g_b),
    # with zeros in the other direction's sub-columns.
    H = HIDDEN
    i, f, g, o = w4h[:, 0:H], w4h[:, H:2 * H], w4h[:, 2 * H:3 * H], w4h[:, 3 * H:4 * H]
    z = jnp.zeros_like(i)
    if direction == "fwd":
        blocks = [i, z, f, z, o, z, g, z]
    else:
        blocks = [z, i, z, f, z, o, z, g]
    return jnp.concatenate(blocks, axis=1)


# ============================ fused forward kernel ============================

def fused_forward_kernel(wp2_ref, char_ref, slab_ref, out_ref,
                         h1pad_sc, out_sc, *, layout, Bx, Lx, CL):
    f32 = jnp.float32
    H, A, T = HIDDEN, ARC_SPACE, TYPE_SPACE
    A1k = A + 1
    N = Bx * Lx
    CN = CL * N

    def w(name):
        off, r, c = layout[name]
        return slab_ref[off:off + r, 0:c]

    # ---------------- CharCNN on zero-bordered slabs (no concatenates) ----------------
    # Rows are char-major: row = c*N + token; a zero slab of N rows sits above and below,
    # so conv1d(k=3, pad=1) tap k is exactly `xpad[k*N : k*N + CN] @ w[k]`.
    def conv3(tap_slice, w_taps, bias, din):
        y = (jnp.dot(tap_slice(0), w_taps[0 * din:1 * din, :], preferred_element_type=f32)
             + jnp.dot(tap_slice(1), w_taps[1 * din:2 * din, :], preferred_element_type=f32)
             + jnp.dot(tap_slice(2), w_taps[2 * din:3 * din, :], preferred_element_type=f32)
             + bias)
        return _elu(y)

    h1 = conv3(lambda k: char_ref[k * N:k * N + CN, :],
               w("conv1_w"), w("conv1_b"), CHAR_DIM)               # [CN, HC]
    # zero-bordered VMEM scratch for the second conv layer's taps
    h1pad_sc[0:N, :] = jnp.zeros((N, HC), f32)
    h1pad_sc[N + CN:N + CN + N, :] = jnp.zeros((N, HC), f32)
    h1pad_sc[N:N + CN, :] = h1
    h2 = conv3(lambda k: h1pad_sc[k * N:k * N + CN, :],
               w("conv2_w"), w("conv2_b"), HC)                     # [CN, CHAR_DIM]
    char_feat = h2[0:N, :]                                         # max over char positions
    for ci in range(1, CL):
        char_feat = jnp.maximum(char_feat, h2[ci * N:(ci + 1) * N, :])   # [N, Dc]

    rev = w("rev")                                                 # [N, N] time reversal
    char_rev = jnp.dot(rev, char_feat, preferred_element_type=f32)  # char feats, reversed time

    # -------- fused input projection into gate-major columns (i|f|o|g, fwd||bwd) --------
    # Row block t already contains fwd x-gates for time t AND bwd x-gates for time L-1-t,
    # so the recurrence loop below needs no per-step gathering.
    xg = (jnp.dot(wp2_ref[...], w("wih_wp2"), preferred_element_type=f32)
          + jnp.dot(char_feat, w("wih_ch_f"), preferred_element_type=f32)
          + jnp.dot(char_rev, w("wih_ch_b"), preferred_element_type=f32)
          + w("lstm_b"))                                           # [N, 8H]

    # ---------------- fused bidirectional recurrence (one matmul / step) ----------------
    whh = w("whh_bd")                                              # [2H, 8H] block-diagonal
    h_state = jnp.zeros((Bx, 2 * H), f32)                          # [h_fwd | h_bwd]
    c_state = jnp.zeros((Bx, 2 * H), f32)
    for t in range(Lx):
        gates = xg[t * Bx:(t + 1) * Bx, :] + jnp.dot(h_state, whh,
                                                     preferred_element_type=f32)
        sig = jax.nn.sigmoid(gates[:, 0:6 * H])                    # i | f | o (both dirs)
        g = jnp.tanh(gates[:, 6 * H:8 * H])
        c_state = sig[:, 2 * H:4 * H] * c_state + sig[:, 0:2 * H] * g
        h_state = sig[:, 4 * H:6 * H] * jnp.tanh(c_state)
        out_sc[t * Bx:(t + 1) * Bx, :] = h_state                   # one [Bx,2H] store / step

    # -------- heads: fwd + (time-un-reversed) bwd hidden -> one fused ELU projection --------
    # out_sc row block t holds [h_fwd(t) | h_bwd(L-1-t)]; 'rev' puts the bwd half back in
    # token order before the head matmul. head_w already carries two exact "ones" lanes
    # (zero weight, bias=1 -> ELU(1)=1) used by the folded biaffine.
    outs = out_sc[...]
    hw = w("head_w")
    bwd_fixed = jnp.dot(rev, outs[:, H:2 * H], preferred_element_type=f32)
    heads = _elu(jnp.dot(outs[:, 0:H], hw[0:H, :], preferred_element_type=f32)
                 + jnp.dot(bwd_fixed, hw[H:2 * H, :], preferred_element_type=f32)
                 + w("head_b"))                                    # [N, 2(A+1)+2T], (l,b) rows

    # (l,b) -> (b,l) with one precomputed permutation matmul (replaces per-batch selectors)
    hb = jnp.dot(w("perm"), heads, preferred_element_type=f32)     # [N, HEAD_COLS], (b,l) rows

    # types: single lane-dense slab store for all tokens
    out_ref[:, Lx:Lx + 2 * T] = hb[:, 2 * A1k:2 * A1k + 2 * T]

    # -------- folded biaffine: [arc_h|1] @ Utilde @ [arc_c|1]^T, qu computed once --------
    qu_all = jnp.dot(hb[:, 0:A1k], w("utilde"), preferred_element_type=f32)   # [N, A+1]
    for b in range(Bx):
        r0 = b * Lx
        scores = jax.lax.dot_general(qu_all[r0:r0 + Lx, :],
                                     hb[r0:r0 + Lx, A1k:2 * A1k],
                                     (((1,), (1,)), ((), ())),
                                     preferred_element_type=f32)              # [L, L]
        out_ref[r0:r0 + Lx, 0:Lx] = scores


# ============================ parameters & forward ============================

def init_params(key):
    ks = jax.random.split(key, 32)

    def u(k, shape, a=0.1):
        return jax.random.uniform(k, shape, jnp.float32, -a, a)

    params = {}
    # embeddings (padding_idx=1 row zeroed, as in reset_parameters)
    params["word_embed"] = u(ks[0], (NUM_WORDS, WORD_DIM)).at[1].set(0.0)
    params["char_embed"] = u(ks[1], (NUM_CHARS, CHAR_DIM)).at[1].set(0.0)
    params["pos_embed"] = u(ks[2], (NUM_POS, POS_DIM)).at[1].set(0.0)
    # CharCNN: conv0 (char_dim -> 4*char_dim), conv_top (4*char_dim -> char_dim)
    params["conv1_w"] = u(ks[3], (3, CHAR_DIM, HC), 0.3)
    params["conv1_b"] = u(ks[4], (HC,), 0.1)
    params["conv2_w"] = u(ks[5], (3, HC, CHAR_DIM), 0.3)
    params["conv2_b"] = u(ks[6], (CHAR_DIM,), 0.1)
    # bidirectional LSTM (num_layers=1), gate order i,f,g,o
    lstm = {}
    for d, kk in zip(("fwd", "bwd"), (ks[7:11], ks[11:15])):
        lstm[d] = dict(
            w_ih=u(kk[0], (DIM_ENC, 4 * HIDDEN), 0.15),
            w_hh=u(kk[1], (HIDDEN, 4 * HIDDEN), 0.15),
            b_ih=u(kk[2], (4 * HIDDEN,), 0.1),
            b_hh=u(kk[3], (4 * HIDDEN,), 0.1),
        )
    params["lstm"] = lstm
    # projection heads (biases start at 0, like reset_parameters)
    params["arc_h_w"] = u(ks[15], (OUT_DIM, ARC_SPACE), 0.15)
    params["arc_h_b"] = jnp.zeros((ARC_SPACE,), jnp.float32)
    params["arc_c_w"] = u(ks[16], (OUT_DIM, ARC_SPACE), 0.15)
    params["arc_c_b"] = jnp.zeros((ARC_SPACE,), jnp.float32)
    params["type_h_w"] = u(ks[17], (OUT_DIM, TYPE_SPACE), 0.15)
    params["type_h_b"] = jnp.zeros((TYPE_SPACE,), jnp.float32)
    params["type_c_w"] = u(ks[18], (OUT_DIM, TYPE_SPACE), 0.15)
    params["type_c_b"] = jnp.zeros((TYPE_SPACE,), jnp.float32)
    # BiAffine(arc_space, arc_space)
    params["U"] = u(ks[19], (ARC_SPACE, ARC_SPACE), 0.2)
    params["q_weight"] = u(ks[20], (ARC_SPACE,), 0.2)
    params["key_weight"] = u(ks[21], (ARC_SPACE,), 0.2)
    params["b_bi"] = jnp.float32(0.0)
    return params


def deep_biaffine_forward(params, input_word, input_char, input_pos):
    Bx, Lx = input_word.shape
    CL = input_char.shape[2]
    N = Bx * Lx
    f32 = jnp.float32
    H, T = HIDDEN, TYPE_SPACE

    # --- embedding lookups (gathers stay in plain JAX; identity dropouts in eval) ---
    word = params["word_embed"][input_word]                    # [B, L, Dw]
    pos = params["pos_embed"][input_pos]                       # [B, L, Dp]
    char_e = params["char_embed"][input_char]                  # [B, L, C, Dc]

    # time-major (l, b) row order; word+pos merged; forward||time-reversed copies fused.
    wp = jnp.concatenate([word, pos], axis=-1).transpose(1, 0, 2).reshape(N, WP_DIM)
    tok = jnp.arange(N)
    t_idx, b_idx = tok // Bx, tok % Bx
    rev_idx = (Lx - 1 - t_idx) * Bx + b_idx
    wp2 = jnp.concatenate([wp, wp[rev_idx]], axis=1)           # [N, 2*WP_DIM]

    # chars: char-major rows (row = c*N + token) with a zero char slab above and below
    char_cm = char_e.transpose(2, 1, 0, 3).reshape(CL * N, CHAR_DIM)
    char_pad = jnp.zeros(((CL + 2) * N, CHAR_DIM), f32).at[N:N + CL * N].set(char_cm)

    # ------------------------- static weight packing -------------------------
    lf, lb = params["lstm"]["fwd"], params["lstm"]["bwd"]
    w_ih_f, w_ih_b = lf["w_ih"], lb["w_ih"]
    wp_rows_f = jnp.concatenate([w_ih_f[0:WORD_DIM], w_ih_f[WORD_DIM + CHAR_DIM:DIM_ENC]], 0)
    wp_rows_b = jnp.concatenate([w_ih_b[0:WORD_DIM], w_ih_b[WORD_DIM + CHAR_DIM:DIM_ENC]], 0)
    wih_wp2 = jnp.concatenate([_place_gates(wp_rows_f, "fwd"),
                               _place_gates(wp_rows_b, "bwd")], axis=0)        # [48, 8H]
    wih_ch_f = _place_gates(w_ih_f[WORD_DIM:WORD_DIM + CHAR_DIM], "fwd")       # [Dc, 8H]
    wih_ch_b = _place_gates(w_ih_b[WORD_DIM:WORD_DIM + CHAR_DIM], "bwd")
    lstm_b = (_place_gates((lf["b_ih"] + lf["b_hh"]).reshape(1, -1), "fwd")
              + _place_gates((lb["b_ih"] + lb["b_hh"]).reshape(1, -1), "bwd")) # [1, 8H]
    whh_bd = jnp.concatenate([_place_gates(lf["w_hh"], "fwd"),
                              _place_gates(lb["w_hh"], "bwd")], axis=0)        # [2H, 8H]

    # fused heads: [arc_h | 1 | arc_c | 1 | type_h | type_c]; the "1" lanes are exact
    # (zero weight, bias=1 -> ELU(1)=1) and feed the augmented biaffine below.
    zcol = jnp.zeros((OUT_DIM, 1), f32)
    one = jnp.ones((1,), f32)
    head_w = jnp.concatenate([params["arc_h_w"], zcol, params["arc_c_w"], zcol,
                              params["type_h_w"], params["type_c_w"]], axis=1)  # [2H, 98]
    head_b = jnp.concatenate([params["arc_h_b"], one, params["arc_c_b"], one,
                              params["type_h_b"], params["type_c_b"]])          # [98]

    # folded biaffine: [arc_h|1] @ [[U,q],[k^T,b]] @ [arc_c|1]^T
    utilde = jnp.zeros((A1, A1), f32)
    utilde = utilde.at[0:ARC_SPACE, 0:ARC_SPACE].set(params["U"])
    utilde = utilde.at[0:ARC_SPACE, ARC_SPACE].set(params["q_weight"])
    utilde = utilde.at[ARC_SPACE, 0:ARC_SPACE].set(params["key_weight"])
    utilde = utilde.at[ARC_SPACE, ARC_SPACE].set(params["b_bi"])

    rev_m = jax.nn.one_hot(rev_idx, N, dtype=f32)                       # time reversal
    bl = jnp.arange(N)
    perm_m = jax.nn.one_hot((bl % Lx) * Bx + (bl // Lx), N, dtype=f32)  # (l,b) -> (b,l)

    layout, slab_rows, slab_cols = _slab_layout(N)
    tensors = {
        "wih_wp2": wih_wp2, "wih_ch_f": wih_ch_f, "wih_ch_b": wih_ch_b,
        "lstm_b": lstm_b, "whh_bd": whh_bd,
        "head_w": head_w, "head_b": head_b, "utilde": utilde,
        "conv1_w": params["conv1_w"].reshape(3 * CHAR_DIM, HC),
        "conv1_b": params["conv1_b"],
        "conv2_w": params["conv2_w"].reshape(3 * HC, CHAR_DIM),
        "conv2_b": params["conv2_b"],
        "rev": rev_m, "perm": perm_m,
    }
    slab = jnp.zeros((slab_rows, slab_cols), f32)
    for name, (off, r, c) in layout.items():
        slab = slab.at[off:off + r, 0:c].set(tensors[name].reshape(r, c).astype(f32))

    vmem = pl.BlockSpec(memory_space=pltpu.MemorySpace.VMEM)
    fused = pl.pallas_call(
        functools.partial(fused_forward_kernel, layout=layout, Bx=Bx, Lx=Lx, CL=CL),
        out_shape=jax.ShapeDtypeStruct((N, Lx + 2 * T), f32),
        in_specs=[vmem, vmem, vmem],
        out_specs=vmem,
        scratch_shapes=[pltpu.VMEM(((CL + 2) * N, HC), f32),   # zero-bordered conv1 output
                        pltpu.VMEM((N, 2 * H), f32)],          # LSTM hidden states
    )(wp2, char_pad, slab)

    out_arc = fused[:, 0:Lx].reshape(Bx, Lx, Lx)
    type_h = fused[:, Lx:Lx + T].reshape(Bx, Lx, T)
    type_c = fused[:, Lx + T:Lx + 2 * T].reshape(Bx, Lx, T)
    return out_arc, (type_h, type_c)


if __name__ == "__main__":
    key = jax.random.PRNGKey(0)
    k_p, k_w, k_c, k_s = jax.random.split(key, 4)
    params = init_params(k_p)

    input_word = jax.random.randint(k_w, (B, L), 0, NUM_WORDS, dtype=jnp.int32)
    input_char = jax.random.randint(k_c, (B, L, CLEN), 0, NUM_CHARS, dtype=jnp.int32)
    input_pos = jax.random.randint(k_s, (B, L), 0, NUM_POS, dtype=jnp.int32)

    fwd = jax.jit(deep_biaffine_forward)
    out_arc, (type_h, type_c) = fwd(params, input_word, input_char, input_pos)
    jax.block_until_ready((out_arc, type_h, type_c))

    assert out_arc.shape == (B, L, L)
    assert type_h.shape == (B, L, TYPE_SPACE)
    assert type_c.shape == (B, L, TYPE_SPACE)
    assert bool(jnp.all(jnp.isfinite(out_arc)))
    assert bool(jnp.all(jnp.isfinite(type_h))) and bool(jnp.all(jnp.isfinite(type_c)))
    print("KERNEL_OK")
</pallas_src>

<mosaic_0001>
module attributes {stable_mosaic.version = 11 : i64} {
  func.func @fused_forward_kernel(%arg0: memref<16x48xf32, #tpu.memory_space<vmem>>, %arg1: memref<128x8xf32, #tpu.memory_space<vmem>>, %arg2: memref<416x256xf32, #tpu.memory_space<vmem>>, %arg3: memref<16x40xf32, #tpu.memory_space<vmem>>, %arg4: memref<128x32xf32, #tpu.memory_space<vmem>>, %arg5: memref<16x64xf32, #tpu.memory_space<vmem>>) attributes {dimension_semantics = [], scalar_prefetch = 0 : i64, scratch_operands = 2 : i64, tpu.core_type = #tpu.core_type<tc>} {
    %c248 = arith.constant 248 : index
    %c0 = arith.constant 0 : index
    %0 = vector.load %arg2[%c248, %c0] : memref<416x256xf32, #tpu.memory_space<vmem>>, vector<24x32xf32>
    %c272 = arith.constant 272 : index
    %c0_0 = arith.constant 0 : index
    %1 = vector.load %arg2[%c272, %c0_0] : memref<416x256xf32, #tpu.memory_space<vmem>>, vector<1x32xf32>
    %c0_1 = arith.constant 0 : index
    %c0_2 = arith.constant 0 : index
    %2 = vector.load %arg1[%c0_1, %c0_2] : memref<128x8xf32, #tpu.memory_space<vmem>>, vector<96x8xf32>
    %3 = vector.extract_strided_slice %0 {offsets = [0, 0], sizes = [8, 32], strides = [1, 1]} : vector<24x32xf32> to vector<8x32xf32>
    %cst = arith.constant dense<0.000000e+00> : vector<96x32xf32>
    %4 = tpu.matmul %2, %3, %cst {dimension_numbers = #tpu.dot_dimension_numbers<[1], [0], [0], [1], [0, 0, 1, 1], [], []>} : vector<96x8xf32>, vector<8x32xf32>, vector<96x32xf32> -> vector<96x32xf32>
    %c16 = arith.constant 16 : index
    %c0_3 = arith.constant 0 : index
    %5 = vector.load %arg1[%c16, %c0_3] : memref<128x8xf32, #tpu.memory_space<vmem>>, vector<96x8xf32>
    %6 = vector.extract_strided_slice %0 {offsets = [8, 0], sizes = [8, 32], strides = [1, 1]} : vector<24x32xf32> to vector<8x32xf32>
    %cst_4 = arith.constant dense<0.000000e+00> : vector<96x32xf32>
    %7 = tpu.matmul %5, %6, %cst_4 {dimension_numbers = #tpu.dot_dimension_numbers<[1], [0], [0], [1], [0, 0, 1, 1], [], []>} : vector<96x8xf32>, vector<8x32xf32>, vector<96x32xf32> -> vector<96x32xf32>
    %8 = arith.addf %4, %7 : vector<96x32xf32>
    %c32 = arith.constant 32 : index
    %c0_5 = arith.constant 0 : index
    %9 = vector.load %arg1[%c32, %c0_5] : memref<128x8xf32, #tpu.memory_space<vmem>>, vector<96x8xf32>
    %10 = vector.extract_strided_slice %0 {offsets = [16, 0], sizes = [8, 32], strides = [1, 1]} : vector<24x32xf32> to vector<8x32xf32>
    %cst_6 = arith.constant dense<0.000000e+00> : vector<96x32xf32>
    %11 = tpu.matmul %9, %10, %cst_6 {dimension_numbers = #tpu.dot_dimension_numbers<[1], [0], [0], [1], [0, 0, 1, 1], [], []>} : vector<96x8xf32>, vector<8x32xf32>, vector<96x32xf32> -> vector<96x32xf32>
    %12 = arith.addf %8, %11 : vector<96x32xf32>
    %13 = vector.broadcast %1 : vector<1x32xf32> to vector<96x32xf32>
    %14 = arith.addf %12, %13 : vector<96x32xf32>
    %cst_7 = arith.constant 0.000000e+00 : f32
    %15 = vector.broadcast %cst_7 : f32 to vector<96x32xf32>
    %16 = arith.cmpf ogt, %14, %15 : vector<96x32xf32>
    %cst_8 = arith.constant 0.000000e+00 : f32
    %17 = vector.broadcast %cst_8 : f32 to vector<96x32xf32>
    %18 = arith.minimumf %14, %17 : vector<96x32xf32>
    %19 = math.exp %18 : vector<96x32xf32>
    %cst_9 = arith.constant 1.000000e+00 : f32
    %20 = vector.broadcast %cst_9 : f32 to vector<96x32xf32>
    %21 = arith.subf %19, %20 : vector<96x32xf32>
    %22 = arith.select %16, %14, %21 : vector<96x32xi1>, vector<96x32xf32>
    %cst_10 = arith.constant 0.000000e+00 : f32
    %23 = vector.broadcast %cst_10 : f32 to vector<16x32xf32>
    %c0_11 = arith.constant 0 : index
    %c0_12 = arith.constant 0 : index
    %24 = vector.load %arg4[%c0_11, %c0_12] : memref<128x32xf32, #tpu.memory_space<vmem>>, vector<16x32xf32>
    tpu.vector_store %arg4[%c0_11, %c0_12], %23 {strides = array<i32>} : memref<128x32xf32, #tpu.memory_space<vmem>>, vector<16x32xf32>,
    %cst_13 = arith.constant 0.000000e+00 : f32
    %25 = vector.broadcast %cst_13 : f32 to vector<16x32xf32>
    %c112 = arith.constant 112 : index
    %c0_14 = arith.constant 0 : index
    %26 = vector.load %arg4[%c112, %c0_14] : memref<128x32xf32, #tpu.memory_space<vmem>>, vector<16x32xf32>
    tpu.vector_store %arg4[%c112, %c0_14], %25 {strides = array<i32>} : memref<128x32xf32, #tpu.memory_space<vmem>>, vector<16x32xf32>,
    %c16_15 = arith.constant 16 : index
    %c0_16 = arith.constant 0 : index
    %27 = vector.load %arg4[%c16_15, %c0_16] : memref<128x32xf32, #tpu.memory_space<vmem>>, vector<96x32xf32>
    tpu.vector_store %arg4[%c16_15, %c0_16], %22 {strides = array<i32>} : memref<128x32xf32, #tpu.memory_space<vmem>>, vector<96x32xf32>,
    %c280 = arith.constant 280 : index
    %c0_17 = arith.constant 0 : index
    %28 = vector.load %arg2[%c280, %c0_17] : memref<416x256xf32, #tpu.memory_space<vmem>>, vector<96x8xf32>
    %c376 = arith.constant 376 : index
    %c0_18 = arith.constant 0 : index
    %29 = vector.load %arg2[%c376, %c0_18] : memref<416x256xf32, #tpu.memory_space<vmem>>, vector<1x8xf32>
    %c0_19 = arith.constant 0 : index
    %c0_20 = arith.constant 0 : index
    %30 = vector.load %arg4[%c0_19, %c0_20] : memref<128x32xf32, #tpu.memory_space<vmem>>, vector<96x32xf32>
    %31 = vector.extract_strided_slice %28 {offsets = [0, 0], sizes = [32, 8], strides = [1, 1]} : vector<96x8xf32> to vector<32x8xf32>
    %cst_21 = arith.constant dense<0.000000e+00> : vector<96x8xf32>
    %32 = tpu.matmul %30, %31, %cst_21 {dimension_numbers = #tpu.dot_dimension_numbers<[1], [0], [0], [1], [0, 0, 1, 1], [], []>} : vector<96x32xf32>, vector<32x8xf32>, vector<96x8xf32> -> vector<96x8xf32>
    %c16_22 = arith.constant 16 : index
    %c0_23 = arith.constant 0 : index
    %33 = vector.load %arg4[%c16_22, %c0_23] : memref<128x32xf32, #tpu.memory_space<vmem>>, vector<96x32xf32>
    %34 = vector.extract_strided_slice %28 {offsets = [32, 0], sizes = [32, 8], strides = [1, 1]} : vector<96x8xf32> to vector<32x8xf32>
    %cst_24 = arith.constant dense<0.000000e+00> : vector<96x8xf32>
    %35 = tpu.matmul %33, %34, %cst_24 {dimension_numbers = #tpu.dot_dimension_numbers<[1], [0], [0], [1], [0, 0, 1, 1], [], []>} : vector<96x32xf32>, vector<32x8xf32>, vector<96x8xf32> -> vector<96x8xf32>
    %36 = arith.addf %32, %35 : vector<96x8xf32>
    %c32_25 = arith.constant 32 : index
    %c0_26 = arith.constant 0 : index
    %37 = vector.load %arg4[%c32_25, %c0_26] : memref<128x32xf32, #tpu.memory_space<vmem>>, vector<96x32xf32>
    %38 = vector.extract_strided_slice %28 {offsets = [64, 0], sizes = [32, 8], strides = [1, 1]} : vector<96x8xf32> to vector<32x8xf32>
    %cst_27 = arith.constant dense<0.000000e+00> : vector<96x8xf32>
    %39 = tpu.matmul %37, %38, %cst_27 {dimension_numbers = #tpu.dot_dimension_numbers<[1], [0], [0], [1], [0, 0, 1, 1], [], []>} : vector<96x32xf32>, vector<32x8xf32>, vector<96x8xf32> -> vector<96x8xf32>
    %40 = arith.addf %36, %39 : vector<96x8xf32>
    %41 = vector.broadcast %29 : vector<1x8xf32> to vector<96x8xf32>
    %42 = arith.addf %40, %41 : vector<96x8xf32>
    %cst_28 = arith.constant 0.000000e+00 : f32
    %43 = vector.broadcast %cst_28 : f32 to vector<96x8xf32>
    %44 = arith.cmpf ogt, %42, %43 : vector<96x8xf32>
    %cst_29 = arith.constant 0.000000e+00 : f32
    %45 = vector.broadcast %cst_29 : f32 to vector<96x8xf32>
    %46 = arith.minimumf %42, %45 : vector<96x8xf32>
    %47 = math.exp %46 : vector<96x8xf32>
    %cst_30 = arith.constant 1.000000e+00 : f32
    %48 = vector.broadcast %cst_30 : f32 to vector<96x8xf32>
    %49 = arith.subf %47, %48 : vector<96x8xf32>
    %50 = arith.select %44, %42, %49 : vector<96x8xi1>, vector<96x8xf32>
    %51 = vector.extract_strided_slice %50 {offsets = [0, 0], sizes = [16, 8], strides = [1, 1]} : vector<96x8xf32> to vector<16x8xf32>
    %52 = vector.extract_strided_slice %50 {offsets = [16, 0], sizes = [16, 8], strides = [1, 1]} : vector<96x8xf32> to vector<16x8xf32>
    %53 = arith.maximumf %51, %52 : vector<16x8xf32>
    %54 = vector.extract_strided_slice %50 {offsets = [32, 0], sizes = [16, 8], strides = [1, 1]} : vector<96x8xf32> to vector<16x8xf32>
    %55 = arith.maximumf %53, %54 : vector<16x8xf32>
    %56 = vector.extract_strided_slice %50 {offsets = [48, 0], sizes = [16, 8], strides = [1, 1]} : vector<96x8xf32> to vector<16x8xf32>
    %57 = arith.maximumf %55, %56 : vector<16x8xf32>
    %58 = vector.extract_strided_slice %50 {offsets = [64, 0], sizes = [16, 8], strides = [1, 1]} : vector<96x8xf32> to vector<16x8xf32>
    %59 = arith.maximumf %57, %58 : vector<16x8xf32>
    %60 = vector.extract_strided_slice %50 {offsets = [80, 0], sizes = [16, 8], strides = [1, 1]} : vector<96x8xf32> to vector<16x8xf32>
    %61 = arith.maximumf %59, %60 : vector<16x8xf32>
    %c384 = arith.constant 384 : index
    %c0_31 = arith.constant 0 : index
    %62 = vector.load %arg2[%c384, %c0_31] : memref<416x256xf32, #tpu.memory_space<vmem>>, vector<16x16xf32>
    %cst_32 = arith.constant dense<0.000000e+00> : vector<16x8xf32>
    %63 = tpu.matmul %62, %61, %cst_32 {dimension_numbers = #tpu.dot_dimension_numbers<[1], [0], [0], [1], [0, 0, 1, 1], [], []>} : vector<16x16xf32>, vector<16x8xf32>, vector<16x8xf32> -> vector<16x8xf32>
    %c0_33 = arith.constant 0 : index
    %c0_34 = arith.constant 0 : index
    %64 = vector.load %arg0[%c0_33, %c0_34] : memref<16x48xf32, #tpu.memory_space<vmem>>, vector<16x48xf32>
    %c0_35 = arith.constant 0 : index
    %c0_36 = arith.constant 0 : index
    %65 = vector.load %arg2[%c0_35, %c0_36] : memref<416x256xf32, #tpu.memory_space<vmem>>, vector<48x256xf32>
    %cst_37 = arith.constant dense<0.000000e+00> : vector<16x256xf32>
    %66 = tpu.matmul %64, %65, %cst_37 {dimension_numbers = #tpu.dot_dimension_numbers<[1], [0], [0], [1], [0, 0, 1, 1], [], []>} : vector<16x48xf32>, vector<48x256xf32>, vector<16x256xf32> -> vector<16x256xf32>
    %c48 = arith.constant 48 : index
    %c0_38 = arith.constant 0 : index
    %67 = vector.load %arg2[%c48, %c0_38] : memref<416x256xf32, #tpu.memory_space<vmem>>, vector<8x256xf32>
    %cst_39 = arith.constant dense<0.000000e+00> : vector<16x256xf32>
    %68 = tpu.matmul %61, %67, %cst_39 {dimension_numbers = #tpu.dot_dimension_numbers<[1], [0], [0], [1], [0, 0, 1, 1], [], []>} : vector<16x8xf32>, vector<8x256xf32>, vector<16x256xf32> -> vector<16x256xf32>
    %69 = arith.addf %66, %68 : vector<16x256xf32>
    %c56 = arith.constant 56 : index
    %c0_40 = arith.constant 0 : index
    %70 = vector.load %arg2[%c56, %c0_40] : memref<416x256xf32, #tpu.memory_space<vmem>>, vector<8x256xf32>
    %cst_41 = arith.constant dense<0.000000e+00> : vector<16x256xf32>
    %71 = tpu.matmul %63, %70, %cst_41 {dimension_numbers = #tpu.dot_dimension_numbers<[1], [0], [0], [1], [0, 0, 1, 1], [], []>} : vector<16x8xf32>, vector<8x256xf32>, vector<16x256xf32> -> vector<16x256xf32>
    %72 = arith.addf %69, %71 : vector<16x256xf32>
    %c64 = arith.constant 64 : index
    %c0_42 = arith.constant 0 : index
    %73 = vector.load %arg2[%c64, %c0_42] : memref<416x256xf32, #tpu.memory_space<vmem>>, vector<1x256xf32>
    %74 = vector.broadcast %73 : vector<1x256xf32> to vector<16x256xf32>
    %75 = arith.addf %72, %74 : vector<16x256xf32>
    %c72 = arith.constant 72 : index
    %c0_43 = arith.constant 0 : index
    %76 = vector.load %arg2[%c72, %c0_43] : memref<416x256xf32, #tpu.memory_space<vmem>>, vector<64x256xf32>
    %cst_44 = arith.constant 0.000000e+00 : f32
    %77 = vector.broadcast %cst_44 : f32 to vector<2x64xf32>
    %cst_45 = arith.constant 0.000000e+00 : f32
    %78 = vector.broadcast %cst_45 : f32 to vector<2x64xf32>
    %79 = vector.extract_strided_slice %75 {offsets = [0, 0], sizes = [2, 256], strides = [1, 1]} : vector<16x256xf32> to vector<2x256xf32>
    %cst_46 = arith.constant dense<0.000000e+00> : vector<2x256xf32>
    %80 = tpu.matmul %77, %76, %cst_46 {dimension_numbers = #tpu.dot_dimension_numbers<[1], [0], [0], [1], [0, 0, 1, 1], [], []>} : vector<2x64xf32>, vector<64x256xf32>, vector<2x256xf32> -> vector<2x256xf32>
    %81 = arith.addf %79, %80 : vector<2x256xf32>
    %82 = vector.extract_strided_slice %81 {offsets = [0, 0], sizes = [2, 192], strides = [1, 1]} : vector<2x256xf32> to vector<2x192xf32>
    %83 = arith.negf %82 : vector<2x192xf32>
    %84 = math.exp %83 : vector<2x192xf32>
    %cst_47 = arith.constant 1.000000e+00 : f32
    %85 = vector.broadcast %cst_47 : f32 to vector<2x192xf32>
    %86 = arith.addf %85, %84 : vector<2x192xf32>
    %87 = arith.divf %85, %86 : vector<2x192xf32>
    %88 = vector.extract_strided_slice %81 {offsets = [0, 192], sizes = [2, 64], strides = [1, 1]} : vector<2x256xf32> to vector<2x64xf32>
    %89 = math.tanh %88 : vector<2x64xf32>
    %90 = vector.extract_strided_slice %87 {offsets = [0, 64], sizes = [2, 64], strides = [1, 1]} : vector<2x192xf32> to vector<2x64xf32>
    %91 = arith.mulf %90, %78 : vector<2x64xf32>
    %92 = vector.extract_strided_slice %87 {offsets = [0, 0], sizes = [2, 64], strides = [1, 1]} : vector<2x192xf32> to vector<2x64xf32>
    %93 = arith.mulf %92, %89 : vector<2x64xf32>
    %94 = arith.addf %91, %93 : vector<2x64xf32>
    %95 = vector.extract_strided_slice %87 {offsets = [0, 128], sizes = [2, 64], strides = [1, 1]} : vector<2x192xf32> to vector<2x64xf32>
    %96 = math.tanh %94 : vector<2x64xf32>
    %97 = arith.mulf %95, %96 : vector<2x64xf32>
    %c0_48 = arith.constant 0 : index
    %c0_49 = arith.constant 0 : index
    %98 = vector.load %arg5[%c0_48, %c0_49] : memref<16x64xf32, #tpu.memory_space<vmem>>, vector<2x64xf32>
    tpu.vector_store %arg5[%c0_48, %c0_49], %97 {strides = array<i32>} : memref<16x64xf32, #tpu.memory_space<vmem>>, vector<2x64xf32>,
    %99 = vector.extract_strided_slice %75 {offsets = [2, 0], sizes = [2, 256], strides = [1, 1]} : vector<16x256xf32> to vector<2x256xf32>
    %cst_50 = arith.constant dense<0.000000e+00> : vector<2x256xf32>
    %100 = tpu.matmul %97, %76, %cst_50 {dimension_numbers = #tpu.dot_dimension_numbers<[1], [0], [0], [1], [0, 0, 1, 1], [], []>} : vector<2x64xf32>, vector<64x256xf32>, vector<2x256xf32> -> vector<2x256xf32>
    %101 = arith.addf %99, %100 : vector<2x256xf32>
    %102 = vector.extract_strided_slice %101 {offsets = [0, 0], sizes = [2, 192], strides = [1, 1]} : vector<2x256xf32> to vector<2x192xf32>
    %103 = arith.negf %102 : vector<2x192xf32>
    %104 = math.exp %103 : vector<2x192xf32>
    %cst_51 = arith.constant 1.000000e+00 : f32
    %105 = vector.broadcast %cst_51 : f32 to vector<2x192xf32>
    %106 = arith.addf %105, %104 : vector<2x192xf32>
    %107 = arith.divf %105, %106 : vector<2x192xf32>
    %108 = vector.extract_strided_slice %101 {offsets = [0, 192], sizes = [2, 64], strides = [1, 1]} : vector<2x256xf32> to vector<2x64xf32>
    %109 = math.tanh %108 : vector<2x64xf32>
    %110 = vector.extract_strided_slice %107 {offsets = [0, 64], sizes = [2, 64], strides = [1, 1]} : vector<2x192xf32> to vector<2x64xf32>
    %111 = arith.mulf %110, %94 : vector<2x64xf32>
    %112 = vector.extract_strided_slice %107 {offsets = [0, 0], sizes = [2, 64], strides = [1, 1]} : vector<2x192xf32> to vector<2x64xf32>
    %113 = arith.mulf %112, %109 : vector<2x64xf32>
    %114 = arith.addf %111, %113 : vector<2x64xf32>
    %115 = vector.extract_strided_slice %107 {offsets = [0, 128], sizes = [2, 64], strides = [1, 1]} : vector<2x192xf32> to vector<2x64xf32>
    %116 = math.tanh %114 : vector<2x64xf32>
    %117 = arith.mulf %115, %116 : vector<2x64xf32>
    %c2 = arith.constant 2 : index
    %c0_52 = arith.constant 0 : index
    %118 = vector.load %arg5[%c2, %c0_52] : memref<16x64xf32, #tpu.memory_space<vmem>>, vector<2x64xf32>
    tpu.vector_store %arg5[%c2, %c0_52], %117 {strides = array<i32>} : memref<16x64xf32, #tpu.memory_space<vmem>>, vector<2x64xf32>,
    %119 = vector.extract_strided_slice %75 {offsets = [4, 0], sizes = [2, 256], strides = [1, 1]} : vector<16x256xf32> to vector<2x256xf32>
    %cst_53 = arith.constant dense<0.000000e+00> : vector<2x256xf32>
    %120 = tpu.matmul %117, %76, %cst_53 {dimension_numbers = #tpu.dot_dimension_numbers<[1], [0], [0], [1], [0, 0, 1, 1], [], []>} : vector<2x64xf32>, vector<64x256xf32>, vector<2x256xf32> -> vector<2x256xf32>
    %121 = arith.addf %119, %120 : vector<2x256xf32>
    %122 = vector.extract_strided_slice %121 {offsets = [0, 0], sizes = [2, 192], strides = [1, 1]} : vector<2x256xf32> to vector<2x192xf32>
    %123 = arith.negf %122 : vector<2x192xf32>
    %124 = math.exp %123 : vector<2x192xf32>
    %cst_54 = arith.constant 1.000000e+00 : f32
    %125 = vector.broadcast %cst_54 : f32 to vector<2x192xf32>
    %126 = arith.addf %125, %124 : vector<2x192xf32>
    %127 = arith.divf %125, %126 : vector<2x192xf32>
    %128 = vector.extract_strided_slice %121 {offsets = [0, 192], sizes = [2, 64], strides = [1, 1]} : vector<2x256xf32> to vector<2x64xf32>
    %129 = math.tanh %128 : vector<2x64xf32>
    %130 = vector.extract_strided_slice %127 {offsets = [0, 64], sizes = [2, 64], strides = [1, 1]} : vector<2x192xf32> to vector<2x64xf32>
    %131 = arith.mulf %130, %114 : vector<2x64xf32>
    %132 = vector.extract_strided_slice %127 {offsets = [0, 0], sizes = [2, 64], strides = [1, 1]} : vector<2x192xf32> to vector<2x64xf32>
    %133 = arith.mulf %132, %129 : vector<2x64xf32>
    %134 = arith.addf %131, %133 : vector<2x64xf32>
    %135 = vector.extract_strided_slice %127 {offsets = [0, 128], sizes = [2, 64], strides = [1, 1]} : vector<2x192xf32> to vector<2x64xf32>
    %136 = math.tanh %134 : vector<2x64xf32>
    %137 = arith.mulf %135, %136 : vector<2x64xf32>
    %c4 = arith.constant 4 : index
    %c0_55 = arith.constant 0 : index
    %138 = vector.load %arg5[%c4, %c0_55] : memref<16x64xf32, #tpu.memory_space<vmem>>, vector<2x64xf32>
    tpu.vector_store %arg5[%c4, %c0_55], %137 {strides = array<i32>} : memref<16x64xf32, #tpu.memory_space<vmem>>, vector<2x64xf32>,
    %139 = vector.extract_strided_slice %75 {offsets = [6, 0], sizes = [2, 256], strides = [1, 1]} : vector<16x256xf32> to vector<2x256xf32>
    %cst_56 = arith.constant dense<0.000000e+00> : vector<2x256xf32>
    %140 = tpu.matmul %137, %76, %cst_56 {dimension_numbers = #tpu.dot_dimension_numbers<[1], [0], [0], [1], [0, 0, 1, 1], [], []>} : vector<2x64xf32>, vector<64x256xf32>, vector<2x256xf32> -> vector<2x256xf32>
    %141 = arith.addf %139, %140 : vector<2x256xf32>
    %142 = vector.extract_strided_slice %141 {offsets = [0, 0], sizes = [2, 192], strides = [1, 1]} : vector<2x256xf32> to vector<2x192xf32>
    %143 = arith.negf %142 : vector<2x192xf32>
    %144 = math.exp %143 : vector<2x192xf32>
    %cst_57 = arith.constant 1.000000e+00 : f32
    %145 = vector.broadcast %cst_57 : f32 to vector<2x192xf32>
    %146 = arith.addf %145, %144 : vector<2x192xf32>
    %147 = arith.divf %145, %146 : vector<2x192xf32>
    %148 = vector.extract_strided_slice %141 {offsets = [0, 192], sizes = [2, 64], strides = [1, 1]} : vector<2x256xf32> to vector<2x64xf32>
    %149 = math.tanh %148 : vector<2x64xf32>
    %150 = vector.extract_strided_slice %147 {offsets = [0, 64], sizes = [2, 64], strides = [1, 1]} : vector<2x192xf32> to vector<2x64xf32>
    %151 = arith.mulf %150, %134 : vector<2x64xf32>
    %152 = vector.extract_strided_slice %147 {offsets = [0, 0], sizes = [2, 64], strides = [1, 1]} : vector<2x192xf32> to vector<2x64xf32>
    %153 = arith.mulf %152, %149 : vector<2x64xf32>
    %154 = arith.addf %151, %153 : vector<2x64xf32>
    %155 = vector.extract_strided_slice %147 {offsets = [0, 128], sizes = [2, 64], strides = [1, 1]} : vector<2x192xf32> to vector<2x64xf32>
    %156 = math.tanh %154 : vector<2x64xf32>
    %157 = arith.mulf %155, %156 : vector<2x64xf32>
    %c6 = arith.constant 6 : index
    %c0_58 = arith.constant 0 : index
    %158 = vector.load %arg5[%c6, %c0_58] : memref<16x64xf32, #tpu.memory_space<vmem>>, vector<2x64xf32>
    tpu.vector_store %arg5[%c6, %c0_58], %157 {strides = array<i32>} : memref<16x64xf32, #tpu.memory_space<vmem>>, vector<2x64xf32>,
    %159 = vector.extract_strided_slice %75 {offsets = [8, 0], sizes = [2, 256], strides = [1, 1]} : vector<16x256xf32> to vector<2x256xf32>
    %cst_59 = arith.constant dense<0.000000e+00> : vector<2x256xf32>
    %160 = tpu.matmul %157, %76, %cst_59 {dimension_numbers = #tpu.dot_dimension_numbers<[1], [0], [0], [1], [0, 0, 1, 1], [], []>} : vector<2x64xf32>, vector<64x256xf32>, vector<2x256xf32> -> vector<2x256xf32>
    %161 = arith.addf %159, %160 : vector<2x256xf32>
    %162 = vector.extract_strided_slice %161 {offsets = [0, 0], sizes = [2, 192], strides = [1, 1]} : vector<2x256xf32> to vector<2x192xf32>
    %163 = arith.negf %162 : vector<2x192xf32>
    %164 = math.exp %163 : vector<2x192xf32>
    %cst_60 = arith.constant 1.000000e+00 : f32
    %165 = vector.broadcast %cst_60 : f32 to vector<2x192xf32>
    %166 = arith.addf %165, %164 : vector<2x192xf32>
    %167 = arith.divf %165, %166 : vector<2x192xf32>
    %168 = vector.extract_strided_slice %161 {offsets = [0, 192], sizes = [2, 64], strides = [1, 1]} : vector<2x256xf32> to vector<2x64xf32>
    %169 = math.tanh %168 : vector<2x64xf32>
    %170 = vector.extract_strided_slice %167 {offsets = [0, 64], sizes = [2, 64], strides = [1, 1]} : vector<2x192xf32> to vector<2x64xf32>
    %171 = arith.mulf %170, %154 : vector<2x64xf32>
    %172 = vector.extract_strided_slice %167 {offsets = [0, 0], sizes = [2, 64], strides = [1, 1]} : vector<2x192xf32> to vector<2x64xf32>
    %173 = arith.mulf %172, %169 : vector<2x64xf32>
    %174 = arith.addf %171, %173 : vector<2x64xf32>
    %175 = vector.extract_strided_slice %167 {offsets = [0, 128], sizes = [2, 64], strides = [1, 1]} : vector<2x192xf32> to vector<2x64xf32>
    %176 = math.tanh %174 : vector<2x64xf32>
    %177 = arith.mulf %175, %176 : vector<2x64xf32>
    %c8 = arith.constant 8 : index
    %c0_61 = arith.constant 0 : index
    %178 = vector.load %arg5[%c8, %c0_61] : memref<16x64xf32, #tpu.memory_space<vmem>>, vector<2x64xf32>
    tpu.vector_store %arg5[%c8, %c0_61], %177 {strides = array<i32>} : memref<16x64xf32, #tpu.memory_space<vmem>>, vector<2x64xf32>,
    %179 = vector.extract_strided_slice %75 {offsets = [10, 0], sizes = [2, 256], strides = [1, 1]} : vector<16x256xf32> to vector<2x256xf32>
    %cst_62 = arith.constant dense<0.000000e+00> : vector<2x256xf32>
    %180 = tpu.matmul %177, %76, %cst_62 {dimension_numbers = #tpu.dot_dimension_numbers<[1], [0], [0], [1], [0, 0, 1, 1], [], []>} : vector<2x64xf32>, vector<64x256xf32>, vector<2x256xf32> -> vector<2x256xf32>
    %181 = arith.addf %179, %180 : vector<2x256xf32>
    %182 = vector.extract_strided_slice %181 {offsets = [0, 0], sizes = [2, 192], strides = [1, 1]} : vector<2x256xf32> to vector<2x192xf32>
    %183 = arith.negf %182 : vector<2x192xf32>
    %184 = math.exp %183 : vector<2x192xf32>
    %cst_63 = arith.constant 1.000000e+00 : f32
    %185 = vector.broadcast %cst_63 : f32 to vector<2x192xf32>
    %186 = arith.addf %185, %184 : vector<2x192xf32>
    %187 = arith.divf %185, %186 : vector<2x192xf32>
    %188 = vector.extract_strided_slice %181 {offsets = [0, 192], sizes = [2, 64], strides = [1, 1]} : vector<2x256xf32> to vector<2x64xf32>
    %189 = math.tanh %188 : vector<2x64xf32>
    %190 = vector.extract_strided_slice %187 {offsets = [0, 64], sizes = [2, 64], strides = [1, 1]} : vector<2x192xf32> to vector<2x64xf32>
    %191 = arith.mulf %190, %174 : vector<2x64xf32>
    %192 = vector.extract_strided_slice %187 {offsets = [0, 0], sizes = [2, 64], strides = [1, 1]} : vector<2x192xf32> to vector<2x64xf32>
    %193 = arith.mulf %192, %189 : vector<2x64xf32>
    %194 = arith.addf %191, %193 : vector<2x64xf32>
    %195 = vector.extract_strided_slice %187 {offsets = [0, 128], sizes = [2, 64], strides = [1, 1]} : vector<2x192xf32> to vector<2x64xf32>
    %196 = math.tanh %194 : vector<2x64xf32>
    %197 = arith.mulf %195, %196 : vector<2x64xf32>
    %c10 = arith.constant 10 : index
    %c0_64 = arith.constant 0 : index
    %198 = vector.load %arg5[%c10, %c0_64] : memref<16x64xf32, #tpu.memory_space<vmem>>, vector<2x64xf32>
    tpu.vector_store %arg5[%c10, %c0_64], %197 {strides = array<i32>} : memref<16x64xf32, #tpu.memory_space<vmem>>, vector<2x64xf32>,
    %199 = vector.extract_strided_slice %75 {offsets = [12, 0], sizes = [2, 256], strides = [1, 1]} : vector<16x256xf32> to vector<2x256xf32>
    %cst_65 = arith.constant dense<0.000000e+00> : vector<2x256xf32>
    %200 = tpu.matmul %197, %76, %cst_65 {dimension_numbers = #tpu.dot_dimension_numbers<[1], [0], [0], [1], [0, 0, 1, 1], [], []>} : vector<2x64xf32>, vector<64x256xf32>, vector<2x256xf32> -> vector<2x256xf32>
    %201 = arith.addf %199, %200 : vector<2x256xf32>
    %202 = vector.extract_strided_slice %201 {offsets = [0, 0], sizes = [2, 192], strides = [1, 1]} : vector<2x256xf32> to vector<2x192xf32>
    %203 = arith.negf %202 : vector<2x192xf32>
    %204 = math.exp %203 : vector<2x192xf32>
    %cst_66 = arith.constant 1.000000e+00 : f32
    %205 = vector.broadcast %cst_66 : f32 to vector<2x192xf32>
    %206 = arith.addf %205, %204 : vector<2x192xf32>
    %207 = arith.divf %205, %206 : vector<2x192xf32>
    %208 = vector.extract_strided_slice %201 {offsets = [0, 192], sizes = [2, 64], strides = [1, 1]} : vector<2x256xf32> to vector<2x64xf32>
    %209 = math.tanh %208 : vector<2x64xf32>
    %210 = vector.extract_strided_slice %207 {offsets = [0, 64], sizes = [2, 64], strides = [1, 1]} : vector<2x192xf32> to vector<2x64xf32>
    %211 = arith.mulf %210, %194 : vector<2x64xf32>
    %212 = vector.extract_strided_slice %207 {offsets = [0, 0], sizes = [2, 64], strides = [1, 1]} : vector<2x192xf32> to vector<2x64xf32>
    %213 = arith.mulf %212, %209 : vector<2x64xf32>
    %214 = arith.addf %211, %213 : vector<2x64xf32>
    %215 = vector.extract_strided_slice %207 {offsets = [0, 128], sizes = [2, 64], strides = [1, 1]} : vector<2x192xf32> to vector<2x64xf32>
    %216 = math.tanh %214 : vector<2x64xf32>
    %217 = arith.mulf %215, %216 : vector<2x64xf32>
    %c12 = arith.constant 12 : index
    %c0_67 = arith.constant 0 : index
    %218 = vector.load %arg5[%c12, %c0_67] : memref<16x64xf32, #tpu.memory_space<vmem>>, vector<2x64xf32>
    tpu.vector_store %arg5[%c12, %c0_67], %217 {strides = array<i32>} : memref<16x64xf32, #tpu.memory_space<vmem>>, vector<2x64xf32>,
    %219 = vector.extract_strided_slice %75 {offsets = [14, 0], sizes = [2, 256], strides = [1, 1]} : vector<16x256xf32> to vector<2x256xf32>
    %cst_68 = arith.constant dense<0.000000e+00> : vector<2x256xf32>
    %220 = tpu.matmul %217, %76, %cst_68 {dimension_numbers = #tpu.dot_dimension_numbers<[1], [0], [0], [1], [0, 0, 1, 1], [], []>} : vector<2x64xf32>, vector<64x256xf32>, vector<2x256xf32> -> vector<2x256xf32>
    %221 = arith.addf %219, %220 : vector<2x256xf32>
    %222 = vector.extract_strided_slice %221 {offsets = [0, 0], sizes = [2, 192], strides = [1, 1]} : vector<2x256xf32> to vector<2x192xf32>
    %223 = arith.negf %222 : vector<2x192xf32>
    %224 = math.exp %223 : vector<2x192xf32>
    %cst_69 = arith.constant 1.000000e+00 : f32
    %225 = vector.broadcast %cst_69 : f32 to vector<2x192xf32>
    %226 = arith.addf %225, %224 : vector<2x192xf32>
    %227 = arith.divf %225, %226 : vector<2x192xf32>
    %228 = vector.extract_strided_slice %221 {offsets = [0, 192], sizes = [2, 64], strides = [1, 1]} : vector<2x256xf32> to vector<2x64xf32>
    %229 = math.tanh %228 : vector<2x64xf32>
    %230 = vector.extract_strided_slice %227 {offsets = [0, 64], sizes = [2, 64], strides = [1, 1]} : vector<2x192xf32> to vector<2x64xf32>
    %231 = arith.mulf %230, %214 : vector<2x64xf32>
    %232 = vector.extract_strided_slice %227 {offsets = [0, 0], sizes = [2, 64], strides = [1, 1]} : vector<2x192xf32> to vector<2x64xf32>
    %233 = arith.mulf %232, %229 : vector<2x64xf32>
    %234 = arith.addf %231, %233 : vector<2x64xf32>
    %235 = vector.extract_strided_slice %227 {offsets = [0, 128], sizes = [2, 64], strides = [1, 1]} : vector<2x192xf32> to vector<2x64xf32>
    %236 = math.tanh %234 : vector<2x64xf32>
    %237 = arith.mulf %235, %236 : vector<2x64xf32>
    %c14 = arith.constant 14 : index
    %c0_70 = arith.constant 0 : index
    %238 = vector.load %arg5[%c14, %c0_70] : memref<16x64xf32, #tpu.memory_space<vmem>>, vector<2x64xf32>
    tpu.vector_store %arg5[%c14, %c0_70], %237 {strides = array<i32>} : memref<16x64xf32, #tpu.memory_space<vmem>>, vector<2x64xf32>,
    %c0_71 = arith.constant 0 : index
    %c0_72 = arith.constant 0 : index
    %239 = vector.load %arg5[%c0_71, %c0_72] : memref<16x64xf32, #tpu.memory_space<vmem>>, vector<16x64xf32>
    %c136 = arith.constant 136 : index
    %c0_73 = arith.constant 0 : index
    %240 = vector.load %arg2[%c136, %c0_73] : memref<416x256xf32, #tpu.memory_space<vmem>>, vector<64x98xf32>
    %241 = vector.extract_strided_slice %239 {offsets = [0, 32], sizes = [16, 32], strides = [1, 1]} : vector<16x64xf32> to vector<16x32xf32>
    %cst_74 = arith.constant dense<0.000000e+00> : vector<16x32xf32>
    %242 = tpu.matmul %62, %241, %cst_74 {dimension_numbers = #tpu.dot_dimension_numbers<[1], [0], [0], [1], [0, 0, 1, 1], [], []>} : vector<16x16xf32>, vector<16x32xf32>, vector<16x32xf32> -> vector<16x32xf32>
    %243 = vector.extract_strided_slice %239 {offsets = [0, 0], sizes = [16, 32], strides = [1, 1]} : vector<16x64xf32> to vector<16x32xf32>
    %244 = vector.extract_strided_slice %240 {offsets = [0, 0], sizes = [32, 98], strides = [1, 1]} : vector<64x98xf32> to vector<32x98xf32>
    %cst_75 = arith.constant dense<0.000000e+00> : vector<16x98xf32>
    %245 = tpu.matmul %243, %244, %cst_75 {dimension_numbers = #tpu.dot_dimension_numbers<[1], [0], [0], [1], [0, 0, 1, 1], [], []>} : vector<16x32xf32>, vector<32x98xf32>, vector<16x98xf32> -> vector<16x98xf32>
    %246 = vector.extract_strided_slice %240 {offsets = [32, 0], sizes = [32, 98], strides = [1, 1]} : vector<64x98xf32> to vector<32x98xf32>
    %cst_76 = arith.constant dense<0.000000e+00> : vector<16x98xf32>
    %247 = tpu.matmul %242, %246, %cst_76 {dimension_numbers = #tpu.dot_dimension_numbers<[1], [0], [0], [1], [0, 0, 1, 1], [], []>} : vector<16x32xf32>, vector<32x98xf32>, vector<16x98xf32> -> vector<16x98xf32>
    %248 = arith.addf %245, %247 : vector<16x98xf32>
    %c200 = arith.constant 200 : index
    %c0_77 = arith.constant 0 : index
    %249 = vector.load %arg2[%c200, %c0_77] : memref<416x256xf32, #tpu.memory_space<vmem>>, vector<1x98xf32>
    %250 = vector.broadcast %249 : vector<1x98xf32> to vector<16x98xf32>
    %251 = arith.addf %248, %250 : vector<16x98xf32>
    %cst_78 = arith.constant 0.000000e+00 : f32
    %252 = vector.broadcast %cst_78 : f32 to vector<16x98xf32>
    %253 = arith.cmpf ogt, %251, %252 : vector<16x98xf32>
    %cst_79 = arith.constant 0.000000e+00 : f32
    %254 = vector.broadcast %cst_79 : f32 to vector<16x98xf32>
    %255 = arith.minimumf %251, %254 : vector<16x98xf32>
    %256 = math.exp %255 : vector<16x98xf32>
    %cst_80 = arith.constant 1.000000e+00 : f32
    %257 = vector.broadcast %cst_80 : f32 to vector<16x98xf32>
    %258 = arith.subf %256, %257 : vector<16x98xf32>
    %259 = arith.select %253, %251, %258 : vector<16x98xi1>, vector<16x98xf32>
    %c400 = arith.constant 400 : index
    %c0_81 = arith.constant 0 : index
    %260 = vector.load %arg2[%c400, %c0_81] : memref<416x256xf32, #tpu.memory_space<vmem>>, vector<16x16xf32>
    %cst_82 = arith.constant dense<0.000000e+00> : vector<16x98xf32>
    %261 = tpu.matmul %260, %259, %cst_82 {dimension_numbers = #tpu.dot_dimension_numbers<[1], [0], [0], [1], [0, 0, 1, 1], [], []>} : vector<16x16xf32>, vector<16x98xf32>, vector<16x98xf32> -> vector<16x98xf32>
    %262 = vector.extract_strided_slice %261 {offsets = [0, 66], sizes = [16, 32], strides = [1, 1]} : vector<16x98xf32> to vector<16x32xf32>
    %c0_83 = arith.constant 0 : index
    %c8_84 = arith.constant 8 : index
    %263 = vector.load %arg3[%c0_83, %c8_84] : memref<16x40xf32, #tpu.memory_space<vmem>>, vector<16x32xf32>
    tpu.vector_store %arg3[%c0_83, %c8_84], %262 {strides = array<i32>} : memref<16x40xf32, #tpu.memory_space<vmem>>, vector<16x32xf32>,
    %264 = vector.extract_strided_slice %261 {offsets = [0, 0], sizes = [16, 33], strides = [1, 1]} : vector<16x98xf32> to vector<16x33xf32>
    %c208 = arith.constant 208 : index
    %c0_85 = arith.constant 0 : index
    %265 = vector.load %arg2[%c208, %c0_85] : memref<416x256xf32, #tpu.memory_space<vmem>>, vector<33x33xf32>
    %cst_86 = arith.constant dense<0.000000e+00> : vector<16x33xf32>
    %266 = tpu.matmul %264, %265, %cst_86 {dimension_numbers = #tpu.dot_dimension_numbers<[1], [0], [0], [1], [0, 0, 1, 1], [], []>} : vector<16x33xf32>, vector<33x33xf32>, vector<16x33xf32> -> vector<16x33xf32>
    %267 = vector.extract_strided_slice %266 {offsets = [0, 0], sizes = [8, 33], strides = [1, 1]} : vector<16x33xf32> to vector<8x33xf32>
    %268 = vector.extract_strided_slice %261 {offsets = [0, 33], sizes = [8, 33], strides = [1, 1]} : vector<16x98xf32> to vector<8x33xf32>
    %cst_87 = arith.constant dense<0.000000e+00> : vector<8x8xf32>
    %269 = tpu.matmul %267, %268, %cst_87 {dimension_numbers = #tpu.dot_dimension_numbers<[1], [1], [0], [0], [0, 0, 1, 0], [], []>} : vector<8x33xf32>, vector<8x33xf32>, vector<8x8xf32> -> vector<8x8xf32>
    %c0_88 = arith.constant 0 : index
    %c0_89 = arith.constant 0 : index
    %270 = vector.load %arg3[%c0_88, %c0_89] : memref<16x40xf32, #tpu.memory_space<vmem>>, vector<8x8xf32>
    tpu.vector_store %arg3[%c0_88, %c0_89], %269 {strides = array<i32>} : memref<16x40xf32, #tpu.memory_space<vmem>>, vector<8x8xf32>,
    %271 = vector.extract_strided_slice %266 {offsets = [8, 0], sizes = [8, 33], strides = [1, 1]} : vector<16x33xf32> to vector<8x33xf32>
    %272 = vector.extract_strided_slice %261 {offsets = [8, 33], sizes = [8, 33], strides = [1, 1]} : vector<16x98xf32> to vector<8x33xf32>
    %cst_90 = arith.constant dense<0.000000e+00> : vector<8x8xf32>
    %273 = tpu.matmul %271, %272, %cst_90 {dimension_numbers = #tpu.dot_dimension_numbers<[1], [1], [0], [0], [0, 0, 1, 0], [], []>} : vector<8x33xf32>, vector<8x33xf32>, vector<8x8xf32> -> vector<8x8xf32>
    %c8_91 = arith.constant 8 : index
    %c0_92 = arith.constant 0 : index
    %274 = vector.load %arg3[%c8_91, %c0_92] : memref<16x40xf32, #tpu.memory_space<vmem>>, vector<8x8xf32>
    tpu.vector_store %arg3[%c8_91, %c0_92], %273 {strides = array<i32>} : memref<16x40xf32, #tpu.memory_space<vmem>>, vector<8x8xf32>,
    return
  }
}

</mosaic_0001>

<bundles_post_ra>
// kernel: deep_biaffine_forward.1
= control target key start
LH: loop header
LB: loop body
LE: loop exit
PB: predicated region body
PF: predicated region fallthrough
CT: control target
= control target key end

     0   :  { %vm32_vm0 = vcmask 64512   ;;  %vm594_vm1 = vcmask 261120   ;;  %v4020_v28 = vmov 0.0   ;;  %vm1211_vm14 = vcmask 130048   ;;  %s4021_s12 = smov 64   ;;  %s4022_s21 = smov 96   ;;  %s4725_s2 = inlined_call_operand.vmem [shape: f32[416,256], index: 2, kind: input, shape index: {}]   ;;  %s4726_s1 = inlined_call_operand.vmem [shape: f32[128,8], index: 1, kind: input, shape index: {}]   ;;  %s4727_s0 = inlined_call_operand.vmem [shape: f32[16,48], index: 0, kind: input, shape index: {}]   ;;  %s4728_s3 = inlined_call_operand.vmem [shape: f32[16,40], index: 3, kind: output, shape index: {}]  }
   0x1   :  { %v15_v0 = vld [vmem:[%s4725_s2 + $0x200] sm:$0xff]  ;;  %v20_v1 = vld [vmem:[%s4726_s1 + $0x10] sm:$0xff]  ;;  %v21_v2 = vld [vmem:[%s4726_s1 + $0x18] sm:$0xff]  ;;  %595 = vst.msk [vmem:[#allocation2] sm:$0xff] %vm594_vm1, %v4020_v28  ;;  %s4023_s17 = smov 95   ;;  %s4024_s18 = smov 70  }
   0x2   :  { %3399 = vmatprep.subr.mxu0 %v15_v0  ;;  %3401 = vmatprep.mubr.msk.f32.mxu0 %vm32_vm0, %v20_v1  ;;  %v22_v3 = vld [vmem:[%s4726_s1 + $0x20] sm:$0xff]  ;;  %v23_v4 = vld [vmem:[%s4726_s1 + $0x28] sm:$0xff]  ;;  %v14_v5 = vld [vmem:[%s4725_s2 + $0x1f0] sm:$0xff]  ;;  %596 = vst.msk [vmem:[#allocation2 + $0x8] sm:$0xff] %vm594_vm1, %v4020_v28 }
   0x3   :  { %3400 = vmatpush3.msra.mxu0 %v15_v0  ;;  %v24_v6 = vld [vmem:[%s4726_s1 + $0x30] sm:$0xff]  ;;  %v25_v8 = vld [vmem:[%s4726_s1 + $0x38] sm:$0xff]  ;;  %v26_v9 = vld [vmem:[%s4726_s1 + $0x40] sm:$0xff]  ;;  %597 = vst.msk [vmem:[#allocation2 + $0x70] sm:$0xff] %vm594_vm1, %v4020_v28 }
   0x4   :  { %3402 = vmatmul.mubr.msk.f32.vlgmr.msra.gmra.mrb[0].mxu0 %vm32_vm0, %v21_v2  ;;  %3419 = vmatprep.subr.mxu0 %v14_v5  ;;  %v16_v7 = vld [vmem:[%s4725_s2 + $0x210] sm:$0xff]  ;;  %v27_v10 = vld [vmem:[%s4726_s1 + $0x48] sm:$0xff]  ;;  %v29_v12 = vld [vmem:[%s4726_s1 + $0x58] sm:$0xff]  ;;  %598 = vst.msk [vmem:[#allocation2 + $0x78] sm:$0xff] %vm594_vm1, %v4020_v28 }
   0x5   :  { %3404 = vmatprep.mubr.msk.f32.mxu0 %vm32_vm0, %v22_v3  ;;  %3420 = vmatpush3.msra.mxu0 %v14_v5  ;;  %v28_v11 = vld [vmem:[%s4726_s1 + $0x50] sm:$0xff]  ;;  %v30_v13 = vld [vmem:[%s4726_s1 + $0x60] sm:$0xff]  ;;  %v31_v14 = vld [vmem:[%s4726_s1 + $0x68] sm:$0xff] }
   0x6   :  { %3439 = vmatprep.subr.mxu0 %v16_v7  ;;  %v18_v15 = vld [vmem:[%s4726_s1] sm:$0xff]  ;;  %v19_v16 = vld [vmem:[%s4726_s1 + $0x8] sm:$0xff]  ;;  %v335_v17 = vld [vmem:[%s4726_s1 + $0x70] sm:$0xff] }
   0x7   :  { %v336_v18 = vld [vmem:[%s4726_s1 + $0x78] sm:$0xff]  ;;  %v615_v19 = vld [vmem:[%s4725_s2 + $0x270] sm:$0xff]  ;;  %v616_v20 = vld [vmem:[%s4725_s2 + $0x280] sm:$0xff] }
   0x8   :  { %3405 = vmatmul.mubr.msk.f32.gmra.mrb[2].mxu0 %vm32_vm0, %v23_v4  ;;  %v3603_v21 = vpack.c.bf16 %v616_v20, %v615_v19  ;;  %v617_v22 = vld [vmem:[%s4725_s2 + $0x290] sm:$0xff]  ;;  %v618_v23 = vld [vmem:[%s4725_s2 + $0x2a0] sm:$0xff] }
   0x9   :  { %3407 = vmatprep.mubr.msk.f32.mxu0 %vm32_vm0, %v24_v6  ;;  %v3607_v24 = vpack.c.bf16 %v618_v23, %v617_v22  ;;  %v611_v25 = vld [vmem:[%s4725_s2 + $0x230] sm:$0xff]  ;;  %v612_v26 = vld [vmem:[%s4725_s2 + $0x240] sm:$0xff] }
   0xa   :  { %3604 = vmatprep.subr.bf16.mxu1 %v3603_v21  ;;  %v4157_v27 = vpack.c.bf16 %v612_v26, %v611_v25  ;;  %v4171_v29 = vld [vmem:[%s4725_s2 + $0x220] ss:$0 sm:$0xff] }
   0xb   :  { %3606 = vmatpush3.bf16.msra.mxu1 %v3603_v21 }
   0xc   :  { %3408 = vmatmul.mubr.msk.f32.gmra.mrb[4].mxu0 %vm32_vm0, %v25_v8  ;;  %3608 = vmatprep.subr.bf16.mxu1 %v3607_v24 }
   0xd   :  { %3410 = vmatprep.mubr.msk.f32.mxu0 %vm32_vm0, %v26_v9 }
   0xf   :  { %3610 = vmatpush3.bf16.msra.mxu1 %v3607_v24 }
  0x10   :  { %3411 = vmatmul.mubr.msk.f32.gmra.mrb[6].mxu0 %vm32_vm0, %v27_v10  ;;  %3612 = vmatprep.subr.bf16.mxu1 %v4157_v27 }
  0x11   :  { %3413 = vmatprep.mubr.msk.f32.mxu0 %vm32_vm0, %v28_v11 }
  0x14   :  { %3414 = vmatmul.mubr.msk.f32.gmra.mrb[8].mxu0 %vm32_vm0, %v29_v12 }
  0x15   :  { %3416 = vmatprep.mubr.msk.f32.mxu0 %vm32_vm0, %v30_v13 }
  0x18   :  { %3417 = vmatmul.mubr.msk.f32.gmra.mrb[10].mxu0 %vm32_vm0, %v31_v14 }
  0x19   :  { %3421 = vmatprep.mubr.msk.f32.mxu0 %vm32_vm0, %v18_v15 }
  0x1c   :  { %3422 = vmatmul.mubr.msk.f32.vlgmr.msra.gmra.mrb[0].mxu0 %vm32_vm0, %v19_v16 }
  0x1d   :  { %3424 = vmatprep.mubr.msk.f32.mxu0 %vm32_vm0, %v20_v1  ;;  %3440 = vmatpush3.msra.mxu0 %v16_v7 }
  0x20   :  { %3425 = vmatmul.mubr.msk.f32.gmra.mrb[2].mxu0 %vm32_vm0, %v21_v2 }
  0x21   :  { %3427 = vmatprep.mubr.msk.f32.mxu0 %vm32_vm0, %v22_v3 }
  0x24   :  { %3428 = vmatmul.mubr.msk.f32.gmra.mrb[4].mxu0 %vm32_vm0, %v23_v4 }
  0x25   :  { %3430 = vmatprep.mubr.msk.f32.mxu0 %vm32_vm0, %v24_v6 }
  0x28   :  { %3431 = vmatmul.mubr.msk.f32.gmra.mrb[6].mxu0 %vm32_vm0, %v25_v8 }
  0x29   :  { %3433 = vmatprep.mubr.msk.f32.mxu0 %vm32_vm0, %v26_v9 }
  0x2c   :  { %3434 = vmatmul.mubr.msk.f32.gmra.mrb[8].mxu0 %vm32_vm0, %v27_v10 }
  0x2d   :  { %3436 = vmatprep.mubr.msk.f32.mxu0 %vm32_vm0, %v28_v11 }
  0x30   :  { %3437 = vmatmul.mubr.msk.f32.gmra.mrb[10].mxu0 %vm32_vm0, %v29_v12 }
  0x31   :  { %3441 = vmatprep.mubr.msk.f32.mxu0 %vm32_vm0, %v22_v3 }
  0x34   :  { %3442 = vmatmul.mubr.msk.f32.vlgmr.msra.gmra.mrb[0].mxu0 %vm32_vm0, %v23_v4 }
  0x35   :  { %3444 = vmatprep.mubr.msk.f32.mxu0 %vm32_vm0, %v24_v6 }
  0x38   :  { %3445 = vmatmul.mubr.msk.f32.gmra.mrb[2].mxu0 %vm32_vm0, %v25_v8 }
  0x39   :  { %3447 = vmatprep.mubr.msk.f32.mxu0 %vm32_vm0, %v26_v9 }
  0x3c   :  { %3448 = vmatmul.mubr.msk.f32.gmra.mrb[4].mxu0 %vm32_vm0, %v27_v10 }
  0x3d   :  { %3450 = vmatprep.mubr.msk.f32.mxu0 %vm32_vm0, %v28_v11 }
  0x40   :  { %3451 = vmatmul.mubr.msk.f32.gmra.mrb[6].mxu0 %vm32_vm0, %v29_v12 }
  0x41   :  { %3453 = vmatprep.mubr.msk.f32.mxu0 %vm32_vm0, %v30_v13 }
  0x44   :  { %3454 = vmatmul.mubr.msk.f32.gmra.mrb[8].mxu0 %vm32_vm0, %v31_v14 }
  0x45   :  { %3456 = vmatprep.mubr.msk.f32.mxu0 %vm32_vm0, %v335_v17 }
  0x48   :  { %3457 = vmatmul.mubr.msk.f32.gmra.mrb[10].mxu0 %vm32_vm0, %v336_v18 }
 0x107   :  { %v3443_v30 = vpop.f32.mrb[0].mxu0 }
 0x108   :  { %v511_v31 = vadd.f32 %v3443_v30, %v4171_v29  ;;  %v439_v32 = vpop.f32.mrb[1].mxu0 }
 0x109   :  { %v510_v33 = vadd.f32 %v439_v32, %v4171_v29  ;;  %v614_v32 = vld [vmem:[%s4725_s2 + $0x260] sm:$0xff] }
 0x10a   :  { %v535_v34 = vmin.f32 %v511_v31, 0.0  ;;  %vm523_vm2 = vcmp.gt.f32.partialorder %v511_v31, 0.0 }
 0x10b   :  { %v534_v35 = vmin.f32 %v510_v33, 0.0  ;;  %v3446_v36 = vpop.f32.mrb[2].mxu0  ;;  %vm522_vm3 = vcmp.gt.f32.partialorder %v510_v33, 0.0 }
 0x10c   :  { %v548_v37 = vmul.f32 1.442695, %v535_v34  ;;  %v513_v38 = vadd.f32 %v3446_v36, %v4171_v29  ;;  %v449_v39 = vpop.f32.mrb[3].mxu0 }
 0x10d   :  { %v546_v40 = vmul.f32 1.442695, %v534_v35  ;;  %v4177_v41 = vadd.f32 %v449_v39, %v4171_v29 }
 0x10e   :  { %3872 = vpow2.f32 %v548_v37  ;;  %v537_v42 = vmin.f32 %v513_v38, 0.0  ;;  %vm525_vm4 = vcmp.gt.f32.partialorder %v513_v38, 0.0 }
 0x10f   :  { %3874 = vpow2.f32 %v546_v40  ;;  %v536_v43 = vmin.f32 %v4177_v41, 0.0  ;;  %v3449_v44 = vpop.f32.mrb[4].mxu0  ;;  %vm524_vm5 = vcmp.gt.f32.partialorder %v4177_v41, 0.0 }
 0x110   :  { %v552_v45 = vmul.f32 1.442695, %v537_v42  ;;  %v4181_v46 = vadd.f32 %v3449_v44, %v4171_v29  ;;  %v459_v47 = vpop.f32.mrb[5].mxu0  ;;  %v619_v42 = vld [vmem:[%s4725_s2 + $0x2b0] sm:$0xff] }
 0x111   :  { %v550_v48 = vmul.f32 1.442695, %v536_v43  ;;  %v4184_v49 = vadd.f32 %v459_v47, %v4171_v29  ;;  %v620_v43 = vld [vmem:[%s4725_s2 + $0x2c0] sm:$0xff] }
 0x112   :  { %3876 = vpow2.f32 %v552_v45  ;;  %v539_v50 = vmin.f32 %v4181_v46, 0.0  ;;  %vm527_vm6 = vcmp.gt.f32.partialorder %v4181_v46, 0.0 }
 0x113   :  { %3878 = vpow2.f32 %v550_v48  ;;  %v538_v51 = vmin.f32 %v4184_v49, 0.0  ;;  %v3452_v52 = vpop.f32.mrb[6].mxu0  ;;  %vm526_vm7 = vcmp.gt.f32.partialorder %v4184_v49, 0.0 }
 0x114   :  { %v556_v53 = vmul.f32 1.442695, %v539_v50  ;;  %v4189_v54 = vadd.f32 %v3452_v52, %v4171_v29  ;;  %v469_v55 = vpop.f32.mrb[7].mxu0 }
 0x115   :  { %v554_v56 = vmul.f32 1.442695, %v538_v51  ;;  %v4192_v57 = vadd.f32 %v469_v55, %v4171_v29 }
 0x116   :  { %3880 = vpow2.f32 %v556_v53  ;;  %v541_v58 = vmin.f32 %v4189_v54, 0.0  ;;  %vm529_vm8 = vcmp.gt.f32.partialorder %v4189_v54, 0.0 }
 0x117   :  { %3882 = vpow2.f32 %v554_v56  ;;  %v540_v59 = vmin.f32 %v4192_v57, 0.0  ;;  %v3455_v60 = vpop.f32.mrb[8].mxu0  ;;  %vm528_vm9 = vcmp.gt.f32.partialorder %v4192_v57, 0.0 }
 0x118   :  { %v3873_v61 = vpop.eup %3872  ;;  %v560_v62 = vmul.f32 1.442695, %v541_v58  ;;  %v4197_v63 = vadd.f32 %v3455_v60, %v4171_v29  ;;  %v479_v0 = vpop.f32.mrb[9].mxu0 }
 0x119   :  { %v3875_v1 = vpop.eup %3874  ;;  %v3169_v2 = vadd.f32 -1.0, %v3873_v61  ;;  %v558_v3 = vmul.f32 1.442695, %v540_v59  ;;  %v4200_v4 = vadd.f32 %v479_v0, %v4171_v29 }
 0x11a   :  { %v3168_v5 = vadd.f32 -1.0, %v3875_v1  ;;  %3884 = vpow2.f32 %v560_v62  ;;  %v543_v6 = vmin.f32 %v4197_v63, 0.0  ;;  %vm531_vm10 = vcmp.gt.f32.partialorder %v4197_v63, 0.0 }
 0x11b   :  { %v583_v7 = vsel %vm523_vm2, %v511_v31, %v3169_v2  ;;  %3886 = vpow2.f32 %v558_v3  ;;  %v542_v8 = vmin.f32 %v4200_v4, 0.0  ;;  %v3458_v9 = vpop.f32.mrb[10].mxu0  ;;  %v613_v31 = vld [vmem:[%s4725_s2 + $0x250] sm:$0xff]  ;;  %vm530_vm11 = vcmp.gt.f32.partialorder %v4200_v4, 0.0 }
 0x11c   :  { %v3877_v10 = vpop.eup %3876  ;;  %600 = vst.msk [vmem:[#allocation2 + $0x18] sm:$0xff] %vm594_vm1, %v583_v7  ;;  %v582_v11 = vsel %vm522_vm3, %v510_v33, %v3168_v5  ;;  %v564_v12 = vmul.f32 1.442695, %v543_v6  ;;  %v4206_v13 = vadd.f32 %v3458_v9, %v4171_v29  ;;  %v489_v14 = vpop.f32.mrb[11].mxu0  ;;  %v621_v6 = vld [vmem:[%s4725_s2 + $0x2d0] sm:$0xff]  ;;  %v622_v7 = vld [vmem:[%s4725_s2 + $0x2e0] sm:$0xff] }
 0x11d   :  { %v3879_v15 = vpop.eup %3878  ;;  %599 = vst.msk [vmem:[#allocation2 + $0x10] sm:$0xff] %vm594_vm1, %v582_v11  ;;  %v3171_v16 = vadd.f32 -1.0, %v3877_v10  ;;  %v562_v17 = vmul.f32 1.442695, %v542_v8  ;;  %v4210_v18 = vadd.f32 %v489_v14, %v4171_v29  ;;  %v625_v8 = vld [vmem:[#allocation2 + $0x8] sm:$0xff]  ;;  %v3623_v9 = vpack.c.bf16 %v622_v7, %v621_v6  ;;  %v940_v10 = vld [vmem:[#allocation2 + $0x70] sm:$0xff] }
 0x11e   :  { %v3170_v19 = vadd.f32 -1.0, %v3879_v15  ;;  %3888 = vpow2.f32 %v564_v12  ;;  %v545_v20 = vmin.f32 %v4206_v13, 0.0  ;;  %vm533_vm12 = vcmp.gt.f32.partialorder %v4206_v13, 0.0  ;;  %v941_v11 = vld [vmem:[#allocation2 + $0x78] sm:$0xff]  ;;  %v4314_v12 = vld [vmem:[%s4725_s2 + $0x300] sm:$0xff]  ;;  %v1585_v14 = vld [vmem:[%s4725_s2 + $0xa8] sm:$0xff] }
 0x11f   :  { %v585_v21 = vsel %vm525_vm4, %v513_v38, %v3171_v16  ;;  %3890 = vpow2.f32 %v562_v17  ;;  %v544_v22 = vmin.f32 %v4210_v18, 0.0  ;;  %v3615_v38 = vpack.c.bf16 %v614_v32, %v613_v31  ;;  %3541 = vmatprep.mubr.msk.f32.mxu0 %vm1211_vm14, %v4314_v12  ;;  %v1582_v15 = vld [vmem:[%s4725_s2 + $0x90] sm:$0xff]  ;;  %v1584_v16 = vld [vmem:[%s4725_s2 + $0xa0] sm:$0xff] }
 0x120   :  { %v3881_v23 = vpop.eup %3880  ;;  %602 = vst.msk [vmem:[#allocation2 + $0x28] sm:$0xff] %vm594_vm1, %v585_v21  ;;  %v584_v24 = vsel %vm524_vm5, %v4177_v41, %v3170_v19  ;;  %v568_v25 = vmul.f32 1.442695, %v545_v20  ;;  %vm532_vm13 = vcmp.gt.f32.partialorder %v4210_v18, 0.0  ;;  %v1587_v19 = vld [vmem:[%s4725_s2 + $0xb8] sm:$0xff]  ;;  %v1589_v20 = vld [vmem:[%s4725_s2 + $0xc8] sm:$0xff] }
 0x121   :  { %v3883_v26 = vpop.eup %3882  ;;  %601 = vst.msk [vmem:[#allocation2 + $0x20] sm:$0xff] %vm594_vm1, %v584_v24  ;;  %v3173_v29 = vadd.f32 -1.0, %v3881_v23  ;;  %v566_v30 = vmul.f32 1.442695, %v544_v22  ;;  %v4341_v21 = vpack.c.bf16 %v1589_v20, %v1587_v19  ;;  %v1586_v22 = vld [vmem:[%s4725_s2 + $0xb0] sm:$0xff]  ;;  %v1588_v23 = vld [vmem:[%s4725_s2 + $0xc0] sm:$0xff] }
 0x122   :  { %v3172_v33 = vadd.f32 -1.0, %v3883_v26  ;;  %3892 = vpow2.f32 %v568_v25  ;;  %v4350_v24 = vpack.c.bf16 %v1588_v23, %v1586_v22  ;;  %v1591_v25 = vld [vmem:[%s4725_s2 + $0xd8] sm:$0xff]  ;;  %v1593_v26 = vld [vmem:[%s4725_s2 + $0xe8] sm:$0xff]  ;;  %v1592_v31 = vld [vmem:[%s4725_s2 + $0xe0] sm:$0xff] }
 0x123   :  { %v587_v34 = vsel %vm527_vm6, %v4181_v46, %v3173_v29  ;;  %3894 = vpow2.f32 %v566_v30  ;;  %v4234_v41 = vld [vmem:[#allocation2 + $0x18] sm:$0xff]  ;;  %v4359_v29 = vpack.c.bf16 %v1593_v26, %v1591_v25  ;;  %v1590_v30 = vld [vmem:[%s4725_s2 + $0xd0] sm:$0xff] }
 0x124   :  { %v3885_v35 = vpop.eup %3884  ;;  %604 = vst.msk [vmem:[#allocation2 + $0x38] sm:$0xff] %vm594_vm1, %v587_v34  ;;  %v586_v36 = vsel %vm526_vm7, %v4184_v49, %v3172_v33  ;;  %v4229_v37 = vld [vmem:[#allocation2 + $0x10] sm:$0xff]  ;;  %v3619_v49 = vpack.c.bf16 %v620_v43, %v619_v42  ;;  %v4368_v32 = vpack.c.bf16 %v1592_v31, %v1590_v30 }
 0x125   :  { %v3887_v39 = vpop.eup %3886  ;;  %603 = vst.msk [vmem:[#allocation2 + $0x30] sm:$0xff] %vm594_vm1, %v586_v36  ;;  %v3175_v40 = vadd.f32 -1.0, %v3885_v35  ;;  %3467 = vmatprep.mubr.msk.f32.mxu1 %vm594_vm1, %v4229_v37  ;;  %v623_v33 = vld [vmem:[%s4725_s2 + $0x2f0] ss:$0 sm:$0xff] }
 0x126   :  { %v3174_v44 = vadd.f32 -1.0, %v3887_v39  ;;  %3468 = vmatmul.mubr.msk.f32.vlgmr.msra.gmra.mrb[0].mxu1 %vm594_vm1, %v4234_v41 }
 0x127   :  { %v589_v45 = vsel %vm529_vm8, %v4189_v54, %v3175_v40  ;;  %3614 = vmatpush3.bf16.msra.mxu1 %v4157_v27  ;;  %v629_v52 = vld [vmem:[#allocation2 + $0x28] sm:$0xff] }
 0x128   :  { %v3889_v46 = vpop.eup %3888  ;;  %606 = vst.msk [vmem:[#allocation2 + $0x48] sm:$0xff] %vm594_vm1, %v589_v45  ;;  %v588_v47 = vsel %vm528_vm9, %v4192_v57, %v3174_v44  ;;  %v4250_v48 = vld [vmem:[#allocation2 + $0x20] sm:$0xff]  ;;  %3616 = vmatprep.subr.bf16.mxu1 %v3615_v38 }
 0x129   :  { %v3891_v50 = vpop.eup %3890  ;;  %605 = vst.msk [vmem:[#allocation2 + $0x40] sm:$0xff] %vm594_vm1, %v588_v47  ;;  %v3177_v51 = vadd.f32 -1.0, %v3889_v46  ;;  %3470 = vmatprep.mubr.msk.f32.mxu1 %vm594_vm1, %v4250_v48 }
 0x12a   :  { %v3176_v27 = vadd.f32 -1.0, %v3891_v50  ;;  %3471 = vmatmul.mubr.msk.f32.gmra.mrb[2].mxu1 %vm594_vm1, %v629_v52 }
 0x12b   :  { %v591_v53 = vsel %vm531_vm10, %v4197_v63, %v3177_v51  ;;  %3618 = vmatpush3.bf16.msra.mxu1 %v3615_v38  ;;  %v631_v59 = vld [vmem:[#allocation2 + $0x38] sm:$0xff] }
 0x12c   :  { %v3893_v54 = vpop.eup %3892  ;;  %608 = vst.msk [vmem:[#allocation2 + $0x58] sm:$0xff] %vm594_vm1, %v591_v53  ;;  %v590_v55 = vsel %vm530_vm11, %v4200_v4, %v3176_v27  ;;  %v630_v56 = vld [vmem:[#allocation2 + $0x30] sm:$0xff]  ;;  %3620 = vmatprep.subr.bf16.mxu1 %v3619_v49  ;;  %v624_v4 = vld [vmem:[#allocation2] sm:$0xff] }
 0x12d   :  { %v3895_v57 = vpop.eup %3894  ;;  %607 = vst.msk [vmem:[#allocation2 + $0x50] sm:$0xff] %vm594_vm1, %v590_v55  ;;  %v3179_v58 = vadd.f32 -1.0, %v3893_v54  ;;  %3473 = vmatprep.mubr.msk.f32.mxu1 %vm594_vm1, %v630_v56 }
 0x12e   :  { %v3178_v60 = vadd.f32 -1.0, %v3895_v57  ;;  %3474 = vmatmul.mubr.msk.f32.gmra.mrb[4].mxu1 %vm594_vm1, %v631_v59 }
 0x12f   :  { %v593_v61 = vsel %vm533_vm12, %v4206_v13, %v3179_v58  ;;  %v633_v0 = vld [vmem:[#allocation2 + $0x48] sm:$0xff]  ;;  %v1583_v13 = vld [vmem:[%s4725_s2 + $0x98] sm:$0xff] }
 0x130   :  { %610 = vst.msk [vmem:[#allocation2 + $0x68] sm:$0xff] %vm594_vm1, %v593_v61  ;;  %v592_v62 = vsel %vm532_vm13, %v4210_v18, %v3178_v60  ;;  %v632_v63 = vld [vmem:[#allocation2 + $0x40] sm:$0xff]  ;;  %v4330_v17 = vpack.c.bf16 %v1585_v14, %v1583_v13  ;;  %v4332_v18 = vpack.c.bf16 %v1584_v16, %v1582_v15  ;;  %vm1392_vm13 = vcmask 392192  }
 0x131   :  { %609 = vst.msk [vmem:[#allocation2 + $0x60] sm:$0xff] %vm594_vm1, %v592_v62  ;;  %3476 = vmatprep.mubr.msk.f32.mxu1 %vm594_vm1, %v632_v63 }
 0x132   :  { %3477 = vmatmul.mubr.msk.f32.gmra.mrb[6].mxu1 %vm594_vm1, %v633_v0 }
 0x133   :  { %v635_v2 = vld [vmem:[#allocation2 + $0x58] sm:$0xff] }
 0x134   :  { %v634_v1 = vld [vmem:[#allocation2 + $0x50] sm:$0xff] }
 0x135   :  { %3479 = vmatprep.mubr.msk.f32.mxu1 %vm594_vm1, %v634_v1 }
 0x136   :  { %3480 = vmatmul.mubr.msk.f32.gmra.mrb[8].mxu1 %vm594_vm1, %v635_v2 }
 0x137   :  { %v637_v5 = vld [vmem:[#allocation2 + $0x68] sm:$0xff] }
 0x138   :  { %v636_v3 = vld [vmem:[#allocation2 + $0x60] sm:$0xff] }
 0x139   :  { %3482 = vmatprep.mubr.msk.f32.mxu1 %vm594_vm1, %v636_v3 }
 0x13a   :  { %3483 = vmatmul.mubr.msk.f32.gmra.mrb[10].mxu1 %vm594_vm1, %v637_v5 }
 0x13b   :  { %3493 = vmatprep.mubr.msk.f32.mxu1 %vm594_vm1, %v624_v4 }
 0x13e   :  { %3494 = vmatmul.mubr.msk.f32.vlgmr.msra.gmra.mrb[0].mxu1 %vm594_vm1, %v625_v8 }
 0x13f   :  { %3496 = vmatprep.mubr.msk.f32.mxu1 %vm594_vm1, %v4229_v37  ;;  %3622 = vmatpush3.bf16.msra.mxu1 %v3619_v49 }
 0x140   :  { %3624 = vmatprep.subr.bf16.mxu1 %v3623_v9 }
 0x142   :  { %3497 = vmatmul.mubr.msk.f32.gmra.mrb[2].mxu1 %vm594_vm1, %v4234_v41 }
 0x143   :  { %3499 = vmatprep.mubr.msk.f32.mxu1 %vm594_vm1, %v4250_v48  ;;  %3626 = vmatpush3.bf16.msra.mxu1 %v3623_v9 }
 0x144   :  { %3644 = vmatprep.subr.bf16.mxu1 %v4330_v17 }
 0x146   :  { %3500 = vmatmul.mubr.msk.f32.gmra.mrb[4].mxu1 %vm594_vm1, %v629_v52 }
 0x147   :  { %3502 = vmatprep.mubr.msk.f32.mxu1 %vm594_vm1, %v630_v56 }
 0x14a   :  { %3503 = vmatmul.mubr.msk.f32.gmra.mrb[6].mxu1 %vm594_vm1, %v631_v59 }
 0x14b   :  { %3505 = vmatprep.mubr.msk.f32.mxu1 %vm594_vm1, %v632_v63 }
 0x14e   :  { %3506 = vmatmul.mubr.msk.f32.gmra.mrb[8].mxu1 %vm594_vm1, %v633_v0 }
 0x14f   :  { %3508 = vmatprep.mubr.msk.f32.mxu1 %vm594_vm1, %v634_v1 }
 0x152   :  { %3509 = vmatmul.mubr.msk.f32.gmra.mrb[10].mxu1 %vm594_vm1, %v635_v2 }
 0x153   :  { %3519 = vmatprep.mubr.msk.f32.mxu1 %vm594_vm1, %v4250_v48 }
 0x156   :  { %3520 = vmatmul.mubr.msk.f32.vlgmr.msra.gmra.mrb[0].mxu1 %vm594_vm1, %v629_v52 }
 0x157   :  { %3522 = vmatprep.mubr.msk.f32.mxu1 %vm594_vm1, %v630_v56  ;;  %3646 = vmatpush1.bf16.msra.mxu1 %v4332_v18 }
 0x158   :  { %3648 = vmatprep.subr.bf16.mxu1 %v4341_v21 }
 0x15a   :  { %3523 = vmatmul.mubr.msk.f32.gmra.mrb[2].mxu1 %vm594_vm1, %v631_v59 }
 0x15b   :  { %3525 = vmatprep.mubr.msk.f32.mxu1 %vm594_vm1, %v632_v63  ;;  %3650 = vmatpush1.bf16.msra.mxu1 %v4350_v24 }
 0x15c   :  { %3652 = vmatprep.subr.bf16.mxu1 %v4359_v29 }
 0x15e   :  { %3526 = vmatmul.mubr.msk.f32.gmra.mrb[4].mxu1 %vm594_vm1, %v633_v0 }
 0x15f   :  { %3528 = vmatprep.mubr.msk.f32.mxu1 %vm594_vm1, %v634_v1  ;;  %3654 = vmatpush1.bf16.msra.mxu1 %v4368_v32 }
 0x162   :  { %3529 = vmatmul.mubr.msk.f32.gmra.mrb[6].mxu1 %vm594_vm1, %v635_v2 }
 0x163   :  { %3531 = vmatprep.mubr.msk.f32.mxu1 %vm594_vm1, %v636_v3 }
 0x166   :  { %3532 = vmatmul.mubr.msk.f32.gmra.mrb[8].mxu1 %vm594_vm1, %v637_v5 }
 0x167   :  { %3534 = vmatprep.mubr.msk.f32.mxu1 %vm594_vm1, %v940_v10 }
 0x16a   :  { %3535 = vmatmul.mubr.msk.f32.gmra.mrb[10].mxu1 %vm594_vm1, %v941_v11 }
 0x16b   :  { %1666 = vmatprep.mubr.f32.mxu1 %v4020_v28 }
 0x229   :  { %v3521_v34 = vpop.f32.mrb[0].mxu1 }
 0x22a   :  { %v4375_v35 = vadd.f32 %v3521_v34, %v623_v33  ;;  %v1044_v36 = vpop.f32.mrb[1].mxu1 }
 0x22b   :  { %v4377_v37 = vadd.f32 %v1044_v36, %v623_v33 }
 0x22c   :  { %v1140_v38 = vmin.f32 %v4375_v35, 0.0  ;;  %vm1128_vm15 = vcmp.gt.f32.partialorder %v4375_v35, 0.0 }
 0x22d   :  { %v1139_v39 = vmin.f32 %v4377_v37, 0.0  ;;  %v3524_v40 = vpop.f32.mrb[2].mxu1  ;;  %vm1127_vm2 = vcmp.gt.f32.partialorder %v4377_v37, 0.0 }
 0x22e   :  { %v1153_v41 = vmul.f32 1.442695, %v1140_v38  ;;  %v1118_v42 = vadd.f32 %v3524_v40, %v623_v33  ;;  %v1054_v43 = vpop.f32.mrb[3].mxu1 }
 0x22f   :  { %v1151_v44 = vmul.f32 1.442695, %v1139_v39  ;;  %v4381_v45 = vadd.f32 %v1054_v43, %v623_v33 }
 0x230   :  { %3896 = vpow2.f32 %v1153_v41  ;;  %v1142_v46 = vmin.f32 %v1118_v42, 0.0  ;;  %vm1130_vm3 = vcmp.gt.f32.partialorder %v1118_v42, 0.0 }
 0x231   :  { %3898 = vpow2.f32 %v1151_v44  ;;  %v1141_v47 = vmin.f32 %v4381_v45, 0.0  ;;  %v3527_v48 = vpop.f32.mrb[4].mxu1  ;;  %vm1129_vm4 = vcmp.gt.f32.partialorder %v4381_v45, 0.0 }
 0x232   :  { %v1157_v49 = vmul.f32 1.442695, %v1142_v46  ;;  %v4384_v50 = vadd.f32 %v3527_v48, %v623_v33  ;;  %v1064_v51 = vpop.f32.mrb[5].mxu1 }
 0x233   :  { %v1155_v52 = vmul.f32 1.442695, %v1141_v47  ;;  %v4386_v27 = vadd.f32 %v1064_v51, %v623_v33 }
 0x234   :  { %3900 = vpow2.f32 %v1157_v49  ;;  %v1144_v53 = vmin.f32 %v4384_v50, 0.0  ;;  %vm1132_vm5 = vcmp.gt.f32.partialorder %v4384_v50, 0.0 }
 0x235   :  { %3902 = vpow2.f32 %v1155_v52  ;;  %v1143_v54 = vmin.f32 %v4386_v27, 0.0  ;;  %v3530_v55 = vpop.f32.mrb[6].mxu1  ;;  %vm1131_vm6 = vcmp.gt.f32.partialorder %v4386_v27, 0.0 }
 0x236   :  { %v1161_v56 = vmul.f32 1.442695, %v1144_v53  ;;  %v4390_v57 = vadd.f32 %v3530_v55, %v623_v33  ;;  %v1074_v58 = vpop.f32.mrb[7].mxu1 }
 0x237   :  { %v1159_v59 = vmul.f32 1.442695, %v1143_v54  ;;  %v4392_v60 = vadd.f32 %v1074_v58, %v623_v33 }
 0x238   :  { %3904 = vpow2.f32 %v1161_v56  ;;  %v1146_v61 = vmin.f32 %v4390_v57, 0.0  ;;  %vm1134_vm7 = vcmp.gt.f32.partialorder %v4390_v57, 0.0 }
 0x239   :  { %3906 = vpow2.f32 %v1159_v59  ;;  %v1145_v62 = vmin.f32 %v4392_v60, 0.0  ;;  %v3533_v63 = vpop.f32.mrb[8].mxu1  ;;  %vm1133_vm8 = vcmp.gt.f32.partialorder %v4392_v60, 0.0 }
 0x23a   :  { %v3897_v0 = vpop.eup %3896  ;;  %v1165_v1 = vmul.f32 1.442695, %v1146_v61  ;;  %v4396_v2 = vadd.f32 %v3533_v63, %v623_v33  ;;  %v1084_v3 = vpop.f32.mrb[9].mxu1 }
 0x23b   :  { %v3899_v4 = vpop.eup %3898  ;;  %v1163_v5 = vmul.f32 1.442695, %v1145_v62  ;;  %v4398_v6 = vadd.f32 %v1084_v3, %v623_v33  ;;  %v3217_v8 = vadd.f32 -1.0, %v3897_v0 }
 0x23c   :  { %3908 = vpow2.f32 %v1165_v1  ;;  %v1148_v7 = vmin.f32 %v4396_v2, 0.0  ;;  %v3216_v13 = vadd.f32 -1.0, %v3899_v4  ;;  %vm1136_vm9 = vcmp.gt.f32.partialorder %v4396_v2, 0.0 }
 0x23d   :  { %3910 = vpow2.f32 %v1163_v5  ;;  %v1147_v9 = vmin.f32 %v4398_v6, 0.0  ;;  %v3536_v10 = vpop.f32.mrb[10].mxu1  ;;  %v1188_v30 = vsel %vm1128_vm15, %v4375_v35, %v3217_v8  ;;  %vm1135_vm10 = vcmp.gt.f32.partialorder %v4398_v6, 0.0 }
 0x23e   :  { %v3901_v11 = vpop.eup %3900  ;;  %v1169_v14 = vmul.f32 1.442695, %v1148_v7  ;;  %v1126_v15 = vadd.f32 %v3536_v10, %v623_v33  ;;  %v1094_v16 = vpop.f32.mrb[11].mxu1  ;;  %v1187_v38 = vsel %vm1127_vm2, %v4377_v37, %v3216_v13  ;;  %v1296_v10 = vld [vmem:[%s4725_s2 + $0x8] sm:$0xff]  ;;  %v1307_v13 = vld [vmem:[%s4725_s2 + $0x60] sm:$0xff]  ;;  %vm1705_vm15 = vcmask 517120  }
 0x23f   :  { %v3903_v19 = vpop.eup %3902  ;;  %v3219_v20 = vadd.f32 -1.0, %v3901_v11  ;;  %v1167_v22 = vmul.f32 1.442695, %v1147_v9  ;;  %v1125_v23 = vadd.f32 %v1094_v16, %v623_v33  ;;  %v4436_v11 = vld [vmem:[%s4725_s2 + $0x310] sm:$0xff]  ;;  %vm1598_vm2 = vcmask 523264  }
 0x240   :  { %v3218_v25 = vadd.f32 -1.0, %v3903_v19  ;;  %3912 = vpow2.f32 %v1169_v14  ;;  %v1150_v26 = vmin.f32 %v1126_v15, 0.0  ;;  %vm1138_vm11 = vcmp.gt.f32.partialorder %v1126_v15, 0.0  ;;  %v1297_v16 = vld [vmem:[%s4725_s2 + $0x10] sm:$0xff]  ;;  %v1300_v19 = vld [vmem:[%s4725_s2 + $0x28] sm:$0xff] }
 0x241   :  { %v1190_v31 = vsel %vm1130_vm3, %v1118_v42, %v3219_v20  ;;  %3914 = vpow2.f32 %v1167_v22  ;;  %v1149_v34 = vmin.f32 %v1125_v23, 0.0  ;;  %vm1137_vm12 = vcmp.gt.f32.partialorder %v1125_v23, 0.0  ;;  %v1302_v20 = vld [vmem:[%s4725_s2 + $0x38] sm:$0xff] }
 0x242   :  { %v3905_v36 = vpop.eup %3904  ;;  %v1200_v39 = vmax.f32 %v1188_v30, %v1190_v31  ;;  %v1189_v33 = vsel %vm1129_vm4, %v4381_v45, %v3218_v25  ;;  %v1173_v40 = vmul.f32 1.442695, %v1150_v26  ;;  %v1299_v25 = vld [vmem:[%s4725_s2 + $0x20] sm:$0xff]  ;;  %v1301_v26 = vld [vmem:[%s4725_s2 + $0x30] sm:$0xff]  ;;  %v1304_v30 = vld [vmem:[%s4725_s2 + $0x48] sm:$0xff]  ;;  %vm1822_vm3 = vcmask 519170  }
 0x243   :  { %v3907_v41 = vpop.eup %3906  ;;  %v1199_v43 = vmax.f32 %v1187_v38, %v1189_v33  ;;  %v3221_v44 = vadd.f32 -1.0, %v3905_v36  ;;  %v1171_v46 = vmul.f32 1.442695, %v1149_v34  ;;  %v1306_v31 = vld [vmem:[%s4725_s2 + $0x58] sm:$0xff]  ;;  %v3637_v34 = vpack.c.bf16 %v1301_v26, %v1299_v25  ;;  %v1303_v38 = vld [vmem:[%s4725_s2 + $0x40] sm:$0xff] }
 0x244   :  { %v3220_v47 = vadd.f32 -1.0, %v3907_v41  ;;  %3916 = vpow2.f32 %v1173_v40  ;;  %v3639_v36 = vpack.c.bf16 %v1306_v31, %v1304_v30  ;;  %v1293_v40 = vld [vmem:[%s4727_s0] sm:$0xff]  ;;  %v1294_v41 = vld [vmem:[%s4727_s0 + $0x8] sm:$0xff]  ;;  %vm1940_vm4 = vcmask 521220  }
 0x245   :  { %v1192_v35 = vsel %vm1132_vm5, %v4384_v50, %v3221_v44  ;;  %3918 = vpow2.f32 %v1171_v46  ;;  %v1597_v44 = vld [vmem:[%s4725_s2 + $0x108] sm:$0xff]  ;;  %vm2058_vm5 = vcmask 523270  }
 0x246   :  { %v3909_v42 = vpop.eup %3908  ;;  %v1202_v48 = vmax.f32 %v1200_v39, %v1192_v35  ;;  %v1191_v37 = vsel %vm1131_vm6, %v4386_v27, %v3220_v47  ;;  %v1305_v39 = vld [vmem:[%s4725_s2 + $0x50] sm:$0xff]  ;;  %v1596_v35 = vld [vmem:[%s4725_s2 + $0x100] sm:$0xff] }
 0x247   :  { %v3911_v49 = vpop.eup %3910  ;;  %v1201_v45 = vmax.f32 %v1199_v43, %v1191_v37  ;;  %v3223_v51 = vadd.f32 -1.0, %v3909_v42  ;;  %v3641_v33 = vpack.c.bf16 %v1305_v39, %v1303_v38  ;;  %v1595_v43 = vld [vmem:[%s4725_s2 + $0xf8] sm:$0xff]  ;;  %v1594_v47 = vld [vmem:[%s4725_s2 + $0xf0] sm:$0xff] }
 0x248   :  { %v3222_v52 = vadd.f32 -1.0, %v3911_v49  ;;  %v4492_v46 = vpack.c.bf16 %v1597_v44, %v1595_v43  ;;  %v4500_v42 = vpack.c.bf16 %v1596_v35, %v1594_v47  ;;  %v1476_v37 = vld [vmem:[%s4725_s2 + $0x70] sm:$0xff] }
 0x249   :  { %v1194_v53 = vsel %vm1134_vm7, %v4390_v57, %v3223_v51  ;;  %v1568_v51 = vlaneseq  ;;  %vm2893_vm7 = vcmask 1040384  }
 0x24a   :  { %v3913_v54 = vpop.eup %3912  ;;  %v1204_v55 = vmax.f32 %v1202_v48, %v1194_v53  ;;  %v1193_v50 = vsel %vm1133_vm8, %v4392_v60, %v3222_v52  ;;  %v1477_v48 = vld [vmem:[%s4725_s2 + $0x78] sm:$0xff]  ;;  %3656 = vmatprep.subr.bf16.mxu1 %v4492_v46  ;;  %vm2888_vm8 = vcmask 269312  }
 0x24b   :  { %v3915_v56 = vpop.eup %3914  ;;  %v1203_v58 = vmax.f32 %v1201_v45, %v1193_v50  ;;  %v3225_v59 = vadd.f32 -1.0, %v3913_v54  ;;  %3658 = vmatpush1.bf16.msra.mxu1 %v4500_v42  ;;  %v1569_v52 = vshrl.u32 %v1568_v51, 7  ;;  %v3236_v54 = vld [vmem:[%s4725_s2 + $0x80] ss:$8 sm:$0x3] }
 0x24c   :  { %v3224_v27 = vadd.f32 -1.0, %v3915_v56  ;;  %3660 = vmatprep.subr.bf16.mxu1 %v4330_v17 }
 0x24d   :  { %v1196_v61 = vsel %vm1136_vm9, %v4396_v2, %v3225_v59  ;;  %v1308_v2 = vld [vmem:[%s4725_s2 + $0x68] sm:$0xff]  ;;  %v1570_v53 = vsub.s32 0, %v1569_v52  ;;  %vm2880_vm9 = vcmask 326720  }
 0x24e   :  { %v3917_v62 = vpop.eup %3916  ;;  %v1206_v63 = vmax.f32 %v1204_v55, %v1196_v61  ;;  %v1195_v57 = vsel %vm1135_vm10, %v4398_v6, %v3224_v27  ;;  %v1298_v6 = vld [vmem:[%s4725_s2 + $0x18] sm:$0xff]  ;;  %1667 = vmatmul.mubr.f32.vlgmr.msra.gmra.mrb[12].mxu1 %v4020_v28 }
 0x24f   :  { %v3919_v0 = vpop.eup %3918  ;;  %v1205_v1 = vmax.f32 %v1203_v58, %v1195_v57  ;;  %v3227_v3 = vadd.f32 -1.0, %v3917_v62  ;;  %v3631_v14 = vpack.c.bf16 %v1298_v6, %v1296_v10  ;;  %3662 = vmatpush1.bf16.msra.mxu1 %v4332_v18  ;;  %1774 = vmatprep.mubr.f32.mxu1 %v4020_v28  ;;  %v1571_v55 = vrot.slane %v3236_v54, %v1570_v53 }
 0x250   :  { %v3226_v4 = vadd.f32 -1.0, %v3919_v0  ;;  %3664 = vmatprep.subr.bf16.mxu1 %v4341_v21  ;;  %v1574_v58 = vsub.s32 1, %v1569_v52 }
 0x251   :  { %v1198_v60 = vsel %vm1138_vm11, %v1126_v15, %v3227_v3  ;;  %v1295_v15 = vld [vmem:[%s4725_s2] sm:$0xff] }
 0x252   :  { %v1197_v5 = vsel %vm1137_vm12, %v1125_v23, %v3226_v4  ;;  %v1208_v7 = vmax.f32 %v1206_v63, %v1198_v60  ;;  %v3633_v22 = vpack.c.bf16 %v1297_v16, %v1295_v15  ;;  %v3635_v23 = vpack.c.bf16 %v1302_v20, %v1300_v19 }
 0x253   :  { %v1207_v8 = vmax.f32 %v1205_v1, %v1197_v5  ;;  %3666 = vmatpush1.bf16.msra.mxu1 %v4350_v24  ;;  %v1575_v59 = vrot.slane %v3236_v54, %v1574_v58 }
 0x254   :  { %3668 = vmatprep.subr.bf16.mxu1 %v4359_v29 }
 0x255   :  { %v3627_v9 = vpack.c.bf16 %v1208_v7, %v1207_v8 }
 0x257   :  { %3628 = vmatprep.subr.bf16.mxu0 %v3627_v9  ;;  %3670 = vmatpush1.bf16.msra.mxu1 %v4368_v32 }
 0x258   :  { %3630 = vmatpush3.bf16.msra.mxu0 %v3627_v9  ;;  %3672 = vmatprep.subr.bf16.mxu1 %v4492_v46 }
 0x259   :  { %1315 = vmatprep.subr.mxu0 %v1308_v2 }
 0x25b   :  { %3542 = vmatmul.mubr.msk.f32.vlgmr.msra.gmra.mrb[12].mxu0 %vm1211_vm14, %v4436_v11  ;;  %3674 = vmatpush1.bf16.msra.mxu1 %v4500_v42 }
 0x25c   :  { %1316 = vmatpush1.msra.mxu0 %v1307_v13  ;;  %1379 = vmatprep.mubr.f32.mxu0 %v4020_v28 }
 0x25d   :  { %3632 = vmatprep.subr.bf16.mxu0 %v3631_v14  ;;  %3676 = vmatprep.subr.bf16.mxu1 %v4330_v17 }
 0x25f   :  { %3230 = vmatmul.mubr.msk.f32.vlgmr.msra.gmra.mrb[14].mxu0 %vm32_vm0, %v1207_v8 }
 0x260   :  { %1385 = vmatprep.mubr.f32.mxu0 %v4020_v28  ;;  %3634 = vmatpush1.bf16.msra.mxu0 %v3633_v22 }
 0x261   :  { %3636 = vmatprep.subr.bf16.mxu0 %v3635_v23 }
 0x263   :  { %3231 = vmatmul.mubr.msk.f32.gmra.mrb[16].mxu0 %vm32_vm0, %v1208_v7 }
 0x264   :  { %3638 = vmatpush1.bf16.msra.mxu0 %v3637_v34  ;;  %1463 = vmatprep.mubr.f32.mxu0 %v4020_v28 }
 0x265   :  { %3640 = vmatprep.subr.bf16.mxu0 %v3639_v36 }
 0x268   :  { %3642 = vmatpush1.bf16.msra.mxu0 %v3641_v33 }
 0x269   :  { %1484 = vmatprep.subr.mxu0 %v1477_v48 }
 0x26b   :  { %3232 = vmatmul.mubr.msk.f32.vlgmr.msra.gmra.mrb[14].mxu0 %vm1392_vm13, %v1293_v40 }
 0x26c   :  { %1469 = vmatprep.mubr.f32.mxu0 %v4020_v28  ;;  %1485 = vmatpush1.msra.mxu0 %v1476_v37 }
 0x26d   :  { %3692 = vmatprep.subr.bf16.mxu0 %v4330_v17 }
 0x26f   :  { %3233 = vmatmul.mubr.msk.f32.gmra.mrb[16].mxu0 %vm1392_vm13, %v1294_v41 }
 0x270   :  { %1548 = vmatprep.mubr.f32.mxu0 %v4020_v28 }
 0x321   :  { %v1668_v50 = vpop.f32.mrb[12].mxu1 }
 0x322   :  { %v1670_v56 = vpop.f32.mrb[13].mxu1 }
 0x32e   :  { %v3543_v49 = vpop.f32.mrb[12].mxu0 }
 0x32f   :  { %v1284_v45 = vpop.f32.mrb[13].mxu0 }
 0x330   :  { %3234 = vmatmul.mubr.msk.f32.vlgmr.msra.gmra.mrb[14].mxu0 %vm32_vm0, %v1284_v45 }
 0x331   :  { %1554 = vmatprep.mubr.f32.mxu0 %v4020_v28  ;;  %3694 = vmatpush1.bf16.msra.mxu0 %v4332_v18 }
 0x332   :  { %3696 = vmatprep.subr.bf16.mxu0 %v4341_v21 }
 0x334   :  { %3235 = vmatmul.mubr.msk.f32.gmra.mrb[16].mxu0 %vm32_vm0, %v3543_v49 }
 0x335   :  { %3698 = vmatpush1.bf16.msra.mxu0 %v4350_v24  ;;  %2010 = vmatprep.mubr.f32.mxu0 %v4020_v28 }
 0x336   :  { %3700 = vmatprep.subr.bf16.mxu0 %v4359_v29 }
 0x339   :  { %3702 = vmatpush1.bf16.msra.mxu0 %v4368_v32 }
 0x33a   :  { %3704 = vmatprep.subr.bf16.mxu0 %v4492_v46 }
 0x33d   :  { %3706 = vmatpush1.bf16.msra.mxu0 %v4500_v42 }
 0x33e   :  { %3724 = vmatprep.subr.bf16.mxu0 %v4330_v17 }
 0x403   :  { %v1550_v27 = vpop.f32.mrb[14].mxu0 }
 0x404   :  { %v4537_v61 = vadd.f32 %v1571_v55, %v1550_v27  ;;  %v1552_v62 = vpop.f32.mrb[15].mxu0 }
 0x405   :  { %v4539_v63 = vadd.f32 %v1575_v59, %v1552_v62 }
 0x406   :  { %v1673_v5 = vadd.f32 %v1668_v50, %v4537_v61 }
 0x407   :  { %v1674_v57 = vadd.f32 %v1670_v56, %v4539_v63  ;;  %v1556_v0 = vpop.f32.mrb[16].mxu0 }
 0x408   :  { %v4542_v1 = vadd.f32 %v1571_v55, %v1556_v0  ;;  %v1558_v3 = vpop.f32.mrb[17].mxu0  ;;  %v3237_v7 = vmul.f32 -1.442695, %v1673_v5 }
 0x409   :  { %3920 = vtanh.f32 %v1674_v57  ;;  %v4544_v4 = vadd.f32 %v1575_v59, %v1558_v3  ;;  %v3238_v19 = vmul.f32 -1.442695, %v1674_v57 }
 0x40a   :  { %3922 = vpow2.f32 %v3237_v7 }
 0x413   :  { %v3921_v60 = vpop.eup %3920 }
 0x414   :  { %1690 = vrot.lane.b32.xlu0 %v3921_v60, %s4021_s12  ;;  %v3923_v8 = vpop.eup %3922 }
 0x415   :  { %v1681_v9 = vadd.f32 1.0, %v3923_v8 }
 0x417   :  { %3924 = vrcp.f32 %v1681_v9 }
 0x421   :  { %v3925_v2 = vpop.eup %3924 }
 0x422   :  { %v1688_v13 = vmul.f32 0.0, %v3925_v2 }
 0x486   :  { %v1691_v10 = vpop.permute.xlu0 %1690 }
 0x487   :  { %v1693_v6 = vmul.f32 %v3925_v2, %v1691_v10 }
 0x489   :  { %1695 = vrot.lane.b32.xlu0 %v1693_v6, %s4021_s12 }
 0x4fb   :  { %v1696_v14 = vpop.permute.xlu0 %1695 }
 0x4fc   :  { %v1698_v15 = vadd.f32 %v1696_v14, %v1688_v13 }
 0x4fe   :  { %3926 = vtanh.f32 %v1698_v15  ;;  %v1803_v48 = vrot.slane %v1698_v15, 6 }
 0x4ff   :  { %3928 = vpow2.f32 %v3238_v19 }
 0x508   :  { %v3927_v16 = vpop.eup %3926 }
 0x509   :  { %1701 = vrot.lane.b32.xlu1 %v3927_v16, %s4021_s12  ;;  %v3929_v20 = vpop.eup %3928 }
 0x50a   :  { %v1682_v22 = vadd.f32 1.0, %v3929_v20 }
 0x50c   :  { %3930 = vrcp.f32 %v1682_v22 }
 0x516   :  { %v3931_v23 = vpop.eup %3930 }
 0x57b   :  { %v1702_v25 = vpop.permute.xlu1 %1701 }
 0x57c   :  { %v1704_v26 = vmul.f32 %v3931_v23, %v1702_v25 }
 0x57e   :  { %1706 = vst.msk [vmem:[#allocation3] sm:$0x3] %vm1705_vm15, %v1704_v26  ;;  %3239 = vmatmul.mubr.msk.f32.vlgmr.msra.gmra.mrb[14].mxu1 %vm1598_vm2, %v1704_v26 }
 0x57f   :  { %3678 = vmatpush1.bf16.msra.mxu1 %v4332_v18  ;;  %1892 = vmatprep.mubr.f32.mxu1 %v4020_v28 }
 0x580   :  { %3680 = vmatprep.subr.bf16.mxu1 %v4341_v21 }
 0x583   :  { %3682 = vmatpush1.bf16.msra.mxu1 %v4350_v24 }
 0x584   :  { %3684 = vmatprep.subr.bf16.mxu1 %v4359_v29 }
 0x587   :  { %3686 = vmatpush1.bf16.msra.mxu1 %v4368_v32 }
 0x588   :  { %3688 = vmatprep.subr.bf16.mxu1 %v4492_v46 }
 0x58b   :  { %3690 = vmatpush1.bf16.msra.mxu1 %v4500_v42 }
 0x58c   :  { %3708 = vmatprep.subr.bf16.mxu1 %v4330_v17 }
 0x651   :  { %v1776_v30 = vpop.f32.mrb[14].mxu1 }
 0x652   :  { %v1778_v31 = vpop.f32.mrb[15].mxu1  ;;  %v1783_v39 = vrot.slane %v1776_v30, 6 }
 0x653   :  { %v1784_v34 = vrot.slane %v1778_v31, 6 }
 0x654   :  { %v1787_v33 = vadd.f32 %v1783_v39, %v4537_v61 }
 0x655   :  { %v1788_v36 = vadd.f32 %v1784_v34, %v4539_v63 }
 0x656   :  { %v3240_v40 = vmul.f32 -1.442695, %v1787_v33 }
 0x657   :  { %3932 = vtanh.f32 %v1788_v36  ;;  %v3241_v52 = vmul.f32 -1.442695, %v1788_v36 }
 0x658   :  { %3934 = vpow2.f32 %v3240_v40 }
 0x661   :  { %v3933_v38 = vpop.eup %3932 }
 0x662   :  { %1807 = vrot.lane.b32.xlu1 %v3933_v38, %s4021_s12  ;;  %v3935_v41 = vpop.eup %3934 }
 0x663   :  { %v1795_v43 = vadd.f32 1.0, %v3935_v41 }
 0x665   :  { %3936 = vrcp.f32 %v1795_v43 }
 0x66f   :  { %v3937_v44 = vpop.eup %3936 }
 0x670   :  { %v1805_v37 = vmul.f32 %v3937_v44, %v1803_v48 }
 0x6d4   :  { %v1808_v47 = vpop.permute.xlu1 %1807 }
 0x6d5   :  { %v1810_v35 = vmul.f32 %v3937_v44, %v1808_v47 }
 0x6d7   :  { %1812 = vrot.lane.b32.xlu0 %v1810_v35, %s4021_s12 }
 0x749   :  { %v1813_v49 = vpop.permute.xlu0 %1812 }
 0x74a   :  { %v1815_v45 = vadd.f32 %v1813_v49, %v1805_v37 }
 0x74c   :  { %3938 = vtanh.f32 %v1815_v45  ;;  %v1921_v6 = vrot.slane %v1815_v45, 6 }
 0x74d   :  { %3940 = vpow2.f32 %v3241_v52 }
 0x756   :  { %v3939_v51 = vpop.eup %3938 }
 0x757   :  { %1818 = vrot.lane.b32.xlu1 %v3939_v51, %s4021_s12  ;;  %v3941_v53 = vpop.eup %3940 }
 0x758   :  { %v1796_v54 = vadd.f32 1.0, %v3941_v53 }
 0x75a   :  { %3942 = vrcp.f32 %v1796_v54 }
 0x764   :  { %v3943_v55 = vpop.eup %3942 }
 0x7c9   :  { %v1819_v50 = vpop.permute.xlu1 %1818 }
 0x7ca   :  { %v1821_v56 = vmul.f32 %v3943_v55, %v1819_v50 }
 0x7cc   :  { %1823 = vst.msk [vmem:[#allocation3] sm:$0xc] %vm1822_vm3, %v1821_v56  ;;  %v1825_v58 = vrot.slane %v1821_v56, 2 }
 0x7ce   :  { %3242 = vmatmul.mubr.msk.f32.vlgmr.msra.gmra.mrb[16].mxu1 %vm1598_vm2, %v1825_v58 }
 0x7cf   :  { %3710 = vmatpush1.bf16.msra.mxu1 %v4332_v18  ;;  %2128 = vmatprep.mubr.f32.mxu1 %v4020_v28 }
 0x7d0   :  { %3712 = vmatprep.subr.bf16.mxu1 %v4341_v21 }
 0x7d3   :  { %3714 = vmatpush1.bf16.msra.mxu1 %v4350_v24 }
 0x7d4   :  { %3716 = vmatprep.subr.bf16.mxu1 %v4359_v29 }
 0x7d7   :  { %3718 = vmatpush1.bf16.msra.mxu1 %v4368_v32 }
 0x7d8   :  { %3720 = vmatprep.subr.bf16.mxu1 %v4492_v46 }
 0x7db   :  { %3722 = vmatpush1.bf16.msra.mxu1 %v4500_v42 }
 0x7dc   :  { %3740 = vmatprep.subr.bf16.mxu1 %v4330_v17 }
 0x8a1   :  { %v1894_v59 = vpop.f32.mrb[16].mxu1 }
 0x8a2   :  { %v1896_v27 = vpop.f32.mrb[17].mxu1  ;;  %v1901_v3 = vrot.slane %v1894_v59, 4 }
 0x8a3   :  { %v1902_v62 = vrot.slane %v1896_v27, 4 }
 0x8a4   :  { %v1905_v60 = vadd.f32 %v1901_v3, %v4537_v61 }
 0x8a5   :  { %v1906_v57 = vadd.f32 %v1902_v62, %v4539_v63 }
 0x8a6   :  { %v3243_v5 = vmul.f32 -1.442695, %v1905_v60 }
 0x8a7   :  { %3944 = vtanh.f32 %v1906_v57  ;;  %v3244_v19 = vmul.f32 -1.442695, %v1906_v57 }
 0x8a8   :  { %3946 = vpow2.f32 %v3243_v5 }
 0x8b1   :  { %v3945_v0 = vpop.eup %3944 }
 0x8b2   :  { %1925 = vrot.lane.b32.xlu0 %v3945_v0, %s4021_s12  ;;  %v3947_v7 = vpop.eup %3946 }
 0x8b3   :  { %v1913_v8 = vadd.f32 1.0, %v3947_v7 }
 0x8b5   :  { %3948 = vrcp.f32 %v1913_v8 }
 0x8bf   :  { %v3949_v9 = vpop.eup %3948 }
 0x8c0   :  { %v1923_v13 = vmul.f32 %v3949_v9, %v1921_v6 }
 0x924   :  { %v1926_v2 = vpop.permute.xlu0 %1925 }
 0x925   :  { %v1928_v10 = vmul.f32 %v3949_v9, %v1926_v2 }
 0x927   :  { %1930 = vrot.lane.b32.xlu1 %v1928_v10, %s4021_s12 }
 0x999   :  { %v1931_v14 = vpop.permute.xlu1 %1930 }
 0x99a   :  { %v1933_v15 = vadd.f32 %v1931_v14, %v1923_v13 }
 0x99c   :  { %3950 = vtanh.f32 %v1933_v15  ;;  %v2039_v48 = vrot.slane %v1933_v15, 6 }
 0x99d   :  { %3952 = vpow2.f32 %v3244_v19 }
 0x9a6   :  { %v3951_v16 = vpop.eup %3950 }
 0x9a7   :  { %1936 = vrot.lane.b32.xlu0 %v3951_v16, %s4021_s12  ;;  %v3953_v20 = vpop.eup %3952 }
 0x9a8   :  { %v1914_v22 = vadd.f32 1.0, %v3953_v20 }
 0x9aa   :  { %3954 = vrcp.f32 %v1914_v22 }
 0x9b4   :  { %v3955_v23 = vpop.eup %3954 }
 0xa19   :  { %v1937_v25 = vpop.permute.xlu0 %1936 }
 0xa1a   :  { %v1939_v26 = vmul.f32 %v3955_v23, %v1937_v25 }
 0xa1c   :  { %1941 = vst.msk [vmem:[#allocation3] sm:$0x30] %vm1940_vm4, %v1939_v26  ;;  %v1943_v30 = vrot.slane %v1939_v26, 4 }
 0xa1e   :  { %3245 = vmatmul.mubr.msk.f32.vlgmr.msra.gmra.mrb[18].mxu0 %vm1598_vm2, %v1943_v30 }
 0xa1f   :  { %3726 = vmatpush1.bf16.msra.mxu0 %v4332_v18  ;;  %2238 = vmatprep.mubr.f32.mxu0 %v4020_v28 }
 0xa20   :  { %3728 = vmatprep.subr.bf16.mxu0 %v4341_v21 }
 0xa23   :  { %3730 = vmatpush1.bf16.msra.mxu0 %v4350_v24 }
 0xa24   :  { %3732 = vmatprep.subr.bf16.mxu0 %v4359_v29 }
 0xa27   :  { %3734 = vmatpush1.bf16.msra.mxu0 %v4368_v32 }
 0xa28   :  { %3736 = vmatprep.subr.bf16.mxu0 %v4492_v46 }
 0xa2b   :  { %3738 = vmatpush1.bf16.msra.mxu0 %v4500_v42 }
 0xa2c   :  { %3756 = vmatprep.subr.bf16.mxu0 %v4330_v17 }
 0xaf1   :  { %v2012_v31 = vpop.f32.mrb[18].mxu0 }
 0xaf2   :  { %v2014_v34 = vpop.f32.mrb[19].mxu0  ;;  %v2019_v33 = vrot.slane %v2012_v31, 2 }
 0xaf3   :  { %v2020_v36 = vrot.slane %v2014_v34, 2 }
 0xaf4   :  { %v2023_v40 = vadd.f32 %v2019_v33, %v4537_v61 }
 0xaf5   :  { %v2024_v38 = vadd.f32 %v2020_v36, %v4539_v63 }
 0xaf6   :  { %v3246_v41 = vmul.f32 -1.442695, %v2023_v40 }
 0xaf7   :  { %3956 = vtanh.f32 %v2024_v38  ;;  %v3247_v51 = vmul.f32 -1.442695, %v2024_v38 }
 0xaf8   :  { %3958 = vpow2.f32 %v3246_v41 }
 0xb01   :  { %v3957_v39 = vpop.eup %3956 }
 0xb02   :  { %2043 = vrot.lane.b32.xlu1 %v3957_v39, %s4021_s12  ;;  %v3959_v43 = vpop.eup %3958 }
 0xb03   :  { %v2031_v44 = vadd.f32 1.0, %v3959_v43 }
 0xb05   :  { %3960 = vrcp.f32 %v2031_v44 }
 0xb0f   :  { %v3961_v47 = vpop.eup %3960 }
 0xb10   :  { %v2041_v37 = vmul.f32 %v3961_v47, %v2039_v48 }
 0xb74   :  { %v2044_v35 = vpop.permute.xlu1 %2043 }
 0xb75   :  { %v2046_v17 = vmul.f32 %v3961_v47, %v2044_v35 }
 0xb77   :  { %2048 = vrot.lane.b32.xlu0 %v2046_v17, %s4021_s12 }
 0xbe9   :  { %v2049_v63 = vpop.permute.xlu0 %2048 }
 0xbea   :  { %v2051_v49 = vadd.f32 %v2049_v63, %v2041_v37 }
 0xbec   :  { %3962 = vtanh.f32 %v2051_v49  ;;  %v2151_v8 = vrot.slane %v2051_v49, 6 }
 0xbed   :  { %3964 = vpow2.f32 %v3247_v51 }
 0xbf6   :  { %v3963_v45 = vpop.eup %3962 }
 0xbf7   :  { %2054 = vrot.lane.b32.xlu1 %v3963_v45, %s4021_s12  ;;  %v3965_v61 = vpop.eup %3964 }
 0xbf8   :  { %v2032_v52 = vadd.f32 1.0, %v3965_v61 }
 0xbfa   :  { %3966 = vrcp.f32 %v2032_v52 }
 0xc04   :  { %v3967_v53 = vpop.eup %3966 }
 0xc69   :  { %v2055_v54 = vpop.permute.xlu1 %2054 }
 0xc6a   :  { %v2057_v55 = vmul.f32 %v3967_v53, %v2055_v54 }
 0xc6c   :  { %2059 = vst.msk [vmem:[#allocation3] sm:$0xc0] %vm2058_vm5, %v2057_v55  ;;  %v2061_v50 = vrot.slane %v2057_v55, 6 }
 0xc6e   :  { %3248 = vmatmul.mubr.msk.f32.vlgmr.msra.gmra.mrb[18].mxu1 %vm1598_vm2, %v2061_v50 }
 0xc6f   :  { %3742 = vmatpush1.bf16.msra.mxu1 %v4332_v18  ;;  %2355 = vmatprep.mubr.f32.mxu1 %v4020_v28 }
 0xc70   :  { %3744 = vmatprep.subr.bf16.mxu1 %v4341_v21 }
 0xc73   :  { %3746 = vmatpush1.bf16.msra.mxu1 %v4350_v24 }
 0xc74   :  { %3748 = vmatprep.subr.bf16.mxu1 %v4359_v29 }
 0xc77   :  { %3750 = vmatpush1.bf16.msra.mxu1 %v4368_v32 }
 0xc78   :  { %3752 = vmatprep.subr.bf16.mxu1 %v4492_v46 }
 0xc7b   :  { %3754 = vmatpush1.bf16.msra.mxu1 %v4500_v42 }
 0xd41   :  { %v2130_v56 = vpop.f32.mrb[18].mxu1 }
 0xd42   :  { %v2132_v58 = vpop.f32.mrb[19].mxu1  ;;  %v2135_v62 = vadd.f32 %v2130_v56, %v4542_v1 }
 0xd43   :  { %v2136_v59 = vadd.f32 %v2132_v58, %v4544_v4 }
 0xd44   :  { %v3249_v57 = vmul.f32 -1.442695, %v2135_v62 }
 0xd45   :  { %3968 = vtanh.f32 %v2136_v59  ;;  %v3250_v13 = vmul.f32 -1.442695, %v2136_v59 }
 0xd46   :  { %3970 = vpow2.f32 %v3249_v57 }
 0xd4f   :  { %v3969_v27 = vpop.eup %3968 }
 0xd50   :  { %2155 = vrot.lane.b32.xlu0 %v3969_v27, %s4021_s12  ;;  %v3971_v0 = vpop.eup %3970 }
 0xd51   :  { %v2143_v3 = vadd.f32 1.0, %v3971_v0 }
 0xd53   :  { %3972 = vrcp.f32 %v2143_v3 }
 0xd5d   :  { %v3973_v60 = vpop.eup %3972 }
 0xd5e   :  { %v2153_v9 = vmul.f32 %v3973_v60, %v2151_v8 }
 0xdc2   :  { %v2156_v5 = vpop.permute.xlu0 %2155 }
 0xdc3   :  { %v2158_v7 = vmul.f32 %v3973_v60, %v2156_v5 }
 0xdc5   :  { %2160 = vrot.lane.b32.xlu1 %v2158_v7, %s4021_s12 }
 0xe37   :  { %v2161_v2 = vpop.permute.xlu1 %2160 }
 0xe38   :  { %v2163_v10 = vadd.f32 %v2161_v2, %v2153_v9 }
 0xe3a   :  { %3974 = vtanh.f32 %v2163_v10  ;;  %v2267_v34 = vrot.slane %v2163_v10, 6 }
 0xe3b   :  { %3976 = vpow2.f32 %v3250_v13 }
 0xe44   :  { %v3975_v6 = vpop.eup %3974 }
 0xe45   :  { %2166 = vrot.lane.b32.xlu0 %v3975_v6, %s4021_s12  ;;  %v3977_v14 = vpop.eup %3976 }
 0xe46   :  { %v2144_v15 = vadd.f32 1.0, %v3977_v14 }
 0xe48   :  { %3978 = vrcp.f32 %v2144_v15 }
 0xe52   :  { %v3979_v16 = vpop.eup %3978 }
 0xeb7   :  { %v2167_v19 = vpop.permute.xlu0 %2166 }
 0xeb8   :  { %v2169_v20 = vmul.f32 %v3979_v16, %v2167_v19 }
 0xeba   :  { %2170 = vst.msk [vmem:[#allocation3 + $0x8] sm:$0x3] %vm1705_vm15, %v2169_v20  ;;  %3251 = vmatmul.mubr.msk.f32.vlgmr.msra.gmra.mrb[20].mxu0 %vm1598_vm2, %v2169_v20 }
 0xebb   :  { %3758 = vmatpush1.bf16.msra.mxu0 %v4332_v18  ;;  %2472 = vmatprep.mubr.f32.mxu0 %v4020_v28 }
 0xebc   :  { %3760 = vmatprep.subr.bf16.mxu0 %v4341_v21 }
 0xebf   :  { %3762 = vmatpush1.bf16.msra.mxu0 %v4350_v24 }
 0xec0   :  { %3764 = vmatprep.subr.bf16.mxu0 %v4359_v29 }
 0xec3   :  { %3766 = vmatpush1.bf16.msra.mxu0 %v4368_v32 }
 0xec4   :  { %3768 = vmatprep.subr.bf16.mxu0 %v4492_v46 }
 0xec7   :  { %3770 = vmatpush1.bf16.msra.mxu0 %v4500_v42 }
 0xf8d   :  { %v2240_v22 = vpop.f32.mrb[20].mxu0 }
 0xf8e   :  { %v2242_v23 = vpop.f32.mrb[21].mxu0  ;;  %v2247_v21 = vrot.slane %v2240_v22, 6 }
 0xf8f   :  { %v2248_v25 = vrot.slane %v2242_v23, 6 }
 0xf90   :  { %v2251_v24 = vadd.f32 %v2247_v21, %v4542_v1 }
 0xf91   :  { %v2252_v26 = vadd.f32 %v2248_v25, %v4544_v4 }
 0xf92   :  { %v3252_v30 = vmul.f32 -1.442695, %v2251_v24 }
 0xf93   :  { %3980 = vtanh.f32 %v2252_v26  ;;  %v3253_v40 = vmul.f32 -1.442695, %v2252_v26 }
 0xf94   :  { %3982 = vpow2.f32 %v3252_v30 }
 0xf9d   :  { %v3981_v18 = vpop.eup %3980 }
 0xf9e   :  { %2271 = vrot.lane.b32.xlu1 %v3981_v18, %s4021_s12  ;;  %v3983_v29 = vpop.eup %3982 }
 0xf9f   :  { %v2259_v32 = vadd.f32 1.0, %v3983_v29 }
 0xfa1   :  { %3984 = vrcp.f32 %v2259_v32 }
 0xfab   :  { %v3985_v46 = vpop.eup %3984 }
 0xfac   :  { %v2269_v36 = vmul.f32 %v3985_v46, %v2267_v34  ;;  %v2528_v34 = vld [vmem:[%s4725_s2 + $0x160] sm:$0xff] }
0x1010   :  { %v2272_v31 = vpop.permute.xlu1 %2271 }
0x1011   :  { %v2274_v42 = vmul.f32 %v3985_v46, %v2272_v31 }
0x1013   :  { %2276 = vrot.lane.b32.xlu0 %v2274_v42, %s4021_s12  ;;  %v2527_v42 = vld [vmem:[%s4725_s2 + $0x150] sm:$0xff] }
0x1085   :  { %v2277_v38 = vpop.permute.xlu0 %2276 }
0x1086   :  { %v2279_v39 = vadd.f32 %v2277_v38, %v2269_v36  ;;  %v2529_v36 = vld [vmem:[%s4725_s2 + $0x170] sm:$0xff]  ;;  %v3775_v38 = vpack.c.bf16 %v2528_v34, %v2527_v42 }
0x1088   :  { %3986 = vtanh.f32 %v2279_v39  ;;  %v2384_v56 = vrot.slane %v2279_v39, 6  ;;  %v2530_v39 = vld [vmem:[%s4725_s2 + $0x180] sm:$0xff]  ;;  %3776 = vmatprep.subr.bf16.mxu0 %v3775_v38 }
0x1089   :  { %3988 = vpow2.f32 %v3253_v40 }
0x1092   :  { %v3987_v33 = vpop.eup %3986 }
0x1093   :  { %2282 = vrot.lane.b32.xlu1 %v3987_v33, %s4021_s12  ;;  %v3989_v41 = vpop.eup %3988  ;;  %v2521_v33 = vld [vmem:[#allocation3] sm:$0xff] }
0x1094   :  { %v2260_v43 = vadd.f32 1.0, %v3989_v41  ;;  %v3779_v41 = vpack.c.bf16 %v2530_v39, %v2529_v36 }
0x1096   :  { %3990 = vrcp.f32 %v2260_v43 }
0x10a0   :  { %v3991_v44 = vpop.eup %3990 }
0x1105   :  { %v2283_v47 = vpop.permute.xlu1 %2282 }
0x1106   :  { %v2285_v35 = vmul.f32 %v3991_v44, %v2283_v47 }
0x1108   :  { %2286 = vst.msk [vmem:[#allocation3 + $0x8] sm:$0xc] %vm1822_vm3, %v2285_v35  ;;  %v2288_v17 = vrot.slane %v2285_v35, 2 }
0x110a   :  { %3254 = vmatmul.mubr.msk.f32.vlgmr.msra.gmra.mrb[20].mxu1 %vm1598_vm2, %v2288_v17 }
0x110b   :  { %3548 = vmatprep.mubr.msk.f32.mxu1 %vm1211_vm14, %v4314_v12 }
0x11dd   :  { %v2357_v48 = vpop.f32.mrb[20].mxu1 }
0x11de   :  { %v2359_v37 = vpop.f32.mrb[21].mxu1  ;;  %v2364_v51 = vrot.slane %v2357_v48, 4  ;;  %v2523_v48 = vld [vmem:[%s4725_s2 + $0x110] sm:$0xff] }
0x11df   :  { %v2365_v63 = vrot.slane %v2359_v37, 4  ;;  %v2524_v37 = vld [vmem:[%s4725_s2 + $0x120] sm:$0xff] }
0x11e0   :  { %v2368_v61 = vadd.f32 %v2364_v51, %v4542_v1 }
0x11e1   :  { %v2369_v49 = vadd.f32 %v2365_v63, %v4544_v4  ;;  %v3783_v63 = vpack.c.bf16 %v2524_v37, %v2523_v48 }
0x11e2   :  { %v3255_v52 = vmul.f32 -1.442695, %v2368_v61 }
0x11e3   :  { %3992 = vtanh.f32 %v2369_v49  ;;  %v3256_v57 = vmul.f32 -1.442695, %v2369_v49  ;;  %v2525_v49 = vld [vmem:[%s4725_s2 + $0x130] sm:$0xff] }
0x11e4   :  { %3994 = vpow2.f32 %v3255_v52  ;;  %v2789_v52 = vld [vmem:[%s4725_s2 + $0x320] sm:$0xff] }
0x11ed   :  { %v3993_v45 = vpop.eup %3992 }
0x11ee   :  { %2388 = vrot.lane.b32.xlu0 %v3993_v45, %s4021_s12  ;;  %v3995_v53 = vpop.eup %3994  ;;  %v2526_v45 = vld [vmem:[%s4725_s2 + $0x140] sm:$0xff] }
0x11ef   :  { %v2376_v54 = vadd.f32 1.0, %v3995_v53  ;;  %v3787_v61 = vpack.c.bf16 %v2526_v45, %v2525_v49  ;;  %v2774_v53 = vld [vmem:[%s4725_s2 + $0x190] ss:$0 sm:$0xff] }
0x11f1   :  { %3996 = vrcp.f32 %v2376_v54 }
0x11fb   :  { %v3997_v55 = vpop.eup %3996 }
0x11fc   :  { %v2386_v58 = vmul.f32 %v3997_v55, %v2384_v56 }
0x1260   :  { %v2389_v50 = vpop.permute.xlu0 %2388 }
0x1261   :  { %v2391_v12 = vmul.f32 %v3997_v55, %v2389_v50 }
0x1263   :  { %2393 = vrot.lane.b32.xlu1 %v2391_v12, %s4021_s12 }
0x12d5   :  { %v2394_v59 = vpop.permute.xlu1 %2393 }
0x12d6   :  { %v2396_v27 = vadd.f32 %v2394_v59, %v2386_v58 }
0x12d8   :  { %3998 = vtanh.f32 %v2396_v27  ;;  %v2501_v26 = vrot.slane %v2396_v27, 6 }
0x12d9   :  { %4000 = vpow2.f32 %v3256_v57 }
0x12e2   :  { %v3999_v62 = vpop.eup %3998 }
0x12e3   :  { %2399 = vrot.lane.b32.xlu0 %v3999_v62, %s4021_s12  ;;  %v4001_v0 = vpop.eup %4000 }
0x12e4   :  { %v2377_v3 = vadd.f32 1.0, %v4001_v0 }
0x12e6   :  { %4002 = vrcp.f32 %v2377_v3 }
0x12f0   :  { %v4003_v60 = vpop.eup %4002 }
0x1355   :  { %v2400_v5 = vpop.permute.xlu0 %2399 }
0x1356   :  { %v2402_v7 = vmul.f32 %v4003_v60, %v2400_v5  ;;  %v2883_v60 = vld [vmem:[%s4725_s2 + $0x1a0] sm:$0xff]  ;;  %v2884_v5 = vld [vmem:[%s4725_s2 + $0x1b0] sm:$0xff] }
0x1358   :  { %2403 = vst.msk [vmem:[#allocation3 + $0x8] sm:$0x30] %vm1940_vm4, %v2402_v7  ;;  %v2405_v8 = vrot.slane %v2402_v7, 4 }
0x135a   :  { %3257 = vmatmul.mubr.msk.f32.vlgmr.msra.gmra.mrb[22].mxu0 %vm1598_vm2, %v2405_v8 }
0x135b   :  { %3778 = vmatpush3.bf16.msra.mxu0 %v3775_v38 }
0x135c   :  { %3780 = vmatprep.subr.bf16.mxu0 %v3779_v41 }
0x135f   :  { %3782 = vmatpush3.bf16.msra.mxu0 %v3779_v41 }
0x1360   :  { %3784 = vmatprep.subr.bf16.mxu0 %v3783_v63 }
0x142d   :  { %v2474_v9 = vpop.f32.mrb[22].mxu0 }
0x142e   :  { %v2476_v2 = vpop.f32.mrb[23].mxu0  ;;  %v2481_v14 = vrot.slane %v2474_v9, 2 }
0x142f   :  { %v2482_v10 = vrot.slane %v2476_v2, 2  ;;  %v3795_v2 = vpack.c.bf16 %v2884_v5, %v2883_v60 }
0x1430   :  { %v2485_v15 = vadd.f32 %v2481_v14, %v4542_v1 }
0x1431   :  { %v2486_v6 = vadd.f32 %v2482_v10, %v4544_v4  ;;  %v2885_v10 = vld [vmem:[%s4725_s2 + $0x1c0] sm:$0xff] }
0x1432   :  { %v3258_v16 = vmul.f32 -1.442695, %v2485_v15  ;;  %v2887_v15 = vld [vmem:[%s4725_s2 + $0x1e0] sm:$0x1] }
0x1433   :  { %4004 = vtanh.f32 %v2486_v6  ;;  %v3259_v30 = vmul.f32 -1.442695, %v2486_v6  ;;  %v2886_v6 = vld [vmem:[%s4725_s2 + $0x1d0] sm:$0xff] }
0x1434   :  { %4006 = vpow2.f32 %v3258_v16  ;;  %v3799_v14 = vpack.c.bf16 %v2886_v6, %v2885_v10 }
0x143d   :  { %v4005_v13 = vpop.eup %4004 }
0x143e   :  { %2505 = vrot.lane.b32.xlu1 %v4005_v13, %s4021_s12  ;;  %v4007_v19 = vpop.eup %4006  ;;  %v2790_v13 = vld [vmem:[%s4725_s2 + $0x330] sm:$0xff] }
0x143f   :  { %v2493_v20 = vadd.f32 1.0, %v4007_v19 }
0x1441   :  { %4008 = vrcp.f32 %v2493_v20 }
0x144b   :  { %v4009_v22 = vpop.eup %4008 }
0x144c   :  { %v2503_v18 = vmul.f32 %v4009_v22, %v2501_v26 }
0x14b0   :  { %v2506_v23 = vpop.permute.xlu1 %2505 }
0x14b1   :  { %v2508_v25 = vmul.f32 %v4009_v22, %v2506_v23 }
0x14b3   :  { %2510 = vrot.lane.b32.xlu0 %v2508_v25, %s4021_s12 }
0x1525   :  { %v2511_v4 = vpop.permute.xlu0 %2510 }
0x1526   :  { %v2513_v21 = vadd.f32 %v2511_v4, %v2503_v18 }
0x1528   :  { %4010 = vtanh.f32 %v2513_v21 }
0x1529   :  { %4012 = vpow2.f32 %v3259_v30 }
0x1532   :  { %v4011_v24 = vpop.eup %4010 }
0x1533   :  { %2516 = vrot.lane.b32.xlu1 %v4011_v24, %s4021_s12  ;;  %v4013_v1 = vpop.eup %4012 }
0x1534   :  { %v2494_v29 = vadd.f32 1.0, %v4013_v1 }
0x1536   :  { %4014 = vrcp.f32 %v2494_v29 }
0x1540   :  { %v4015_v32 = vpop.eup %4014 }
0x15a5   :  { %v2517_v46 = vpop.permute.xlu1 %2516 }
0x15a6   :  { %v2519_v31 = vmul.f32 %v4015_v32, %v2517_v46 }
0x15a8   :  { %2520 = vst.msk [vmem:[#allocation3 + $0x8] sm:$0xc0] %vm2058_vm5, %v2519_v31 }
0x15af   :  { %v2522_v40 = vld [vmem:[#allocation3 + $0x8] sm:$0xff] }
0x15b0   :  { %v3867_v43 = vpack.i.bf16 %v2522_v40, %v2521_v33 }
0x15b2   :  { %3868 = vrot.lane.b32.xlu0 %v3867_v43, %s4022_s21 }
0x1624   :  { %v3869_v44 = vpop.permute.xlu0 %3868 }
0x1625   :  { %v3871_v47 = vunpack.i.h.bf16 %v3869_v44  ;;  %v3870_v35 = vunpack.i.l.bf16 %v3869_v44 }
0x1627   :  { %v3771_v17 = vpack.c.bf16 %v3871_v47, %v3870_v35 }
0x1629   :  { %3772 = vmatprep.subr.bf16.mxu1 %v3771_v17 }
0x162a   :  { %3774 = vmatpush3.bf16.msra.mxu1 %v3771_v17 }
0x162d   :  { %3549 = vmatmul.mubr.msk.f32.vlgmr.msra.gmra.mrb[22].mxu1 %vm1211_vm14, %v4436_v11 }
0x162e   :  { %3577 = vmatprep.mubr.msk.f32.mxu1 %vm1211_vm14, %v2789_v52 }
0x1700   :  { %v3550_v51 = vpop.f32.mrb[22].mxu1 }
0x1701   :  { %v2605_v11 = vpop.f32.mrb[23].mxu1 }
0x1702   :  { %3559 = vmatprep.mubr.msk.f32.mxu0 %vm594_vm1, %v2605_v11 }
0x1703   :  { %3560 = vmatmul.mubr.msk.f32.vlgmr.msra.gmra.mrb[24].mxu0 %vm594_vm1, %v3550_v51 }
0x1704   :  { %3786 = vmatpush3.bf16.msra.mxu0 %v3783_v63  ;;  %3570 = vmatprep.mubr.msk.f32.mxu0 %vm594_vm1, %v2521_v33 }
0x1705   :  { %3788 = vmatprep.subr.bf16.mxu0 %v3787_v61 }
0x1708   :  { %3790 = vmatpush3.bf16.msra.mxu0 %v3787_v61 }
0x1709   :  { %3593 = vmatprep.subr.mxu0 %v4020_v28 }
0x170b   :  { %3571 = vmatmul.mubr.msk.f32.vlgmr.msra.gmra.mrb[24].mxu0 %vm594_vm1, %v2522_v40 }
0x17de   :  { %v3572_v54 = vpop.f32.mrb[24].mxu0 }
0x17df   :  { %v2776_v55 = vadd.f32 %v3572_v54, %v2774_v53  ;;  %v2765_v50 = vpop.f32.mrb[25].mxu0 }
0x17e0   :  { %v2775_v12 = vadd.f32 %v2774_v53, %v2765_v50 }
0x17e1   :  { %v2780_v56 = vmin.f32 %v2776_v55, 0.0  ;;  %vm2778_vm1 = vcmp.gt.f32.partialorder %v2776_v55, 0.0 }
0x17e2   :  { %v2779_v58 = vmin.f32 %v2775_v12, 0.0  ;;  %vm2777_vm6 = vcmp.gt.f32.partialorder %v2775_v12, 0.0 }
0x17e3   :  { %v2783_v59 = vmul.f32 1.442695, %v2780_v56 }
0x17e4   :  { %v2781_v27 = vmul.f32 1.442695, %v2779_v58 }
0x17e5   :  { %4016 = vpow2.f32 %v2783_v59 }
0x17e6   :  { %4018 = vpow2.f32 %v2781_v27 }
0x17ef   :  { %v4017_v62 = vpop.eup %4016 }
0x17f0   :  { %v4019_v57 = vpop.eup %4018  ;;  %v3267_v0 = vadd.f32 -1.0, %v4017_v62 }
0x17f1   :  { %v3266_v3 = vadd.f32 -1.0, %v4019_v57 }
0x17f2   :  { %v2788_v7 = vsel %vm2778_vm1, %v2776_v55, %v3267_v0 }
0x17f3   :  { %v2787_v8 = vsel %vm2777_vm6, %v2775_v12, %v3266_v3 }
0x17f4   :  { %v3791_v9 = vpack.c.bf16 %v2788_v7, %v2787_v8 }
0x17f6   :  { %3792 = vmatprep.subr.bf16.mxu1 %v3791_v9 }
0x17f7   :  { %3794 = vmatpush3.bf16.msra.mxu1 %v3791_v9 }
0x17f8   :  { %3796 = vmatprep.subr.bf16.mxu1 %v3795_v2 }
0x17fa   :  { %3578 = vmatmul.mubr.msk.f32.vlgmr.msra.gmra.mrb[24].mxu1 %vm1211_vm14, %v2790_v13  ;;  %vm4025_vm14 = vmmov 0  }
0x17fb   :  { %3798 = vmatpush3.bf16.msra.mxu1 %v3795_v2  ;;  %3595 = vmatprep.mubr.msk.f32.mxu0 %vm4025_vm14, %v4020_v28 }
0x17fc   :  { %3800 = vmatprep.subr.bf16.mxu1 %v3799_v14 }
0x17ff   :  { %3802 = vmatpush3.bf16.msra.mxu1 %v3799_v14 }
0x1800   :  { %3588 = vmatprep.subr.msk.mxu1 %vm2893_vm7, %v2887_v15 }
0x1803   :  { %3589 = vmatpush3.msk.msra.mxu1 %vm2893_vm7, %v2887_v15 }
0x1804   :  { %3598 = vmatprep.subr.mxu1 %v4020_v28 }
0x18cd   :  { %v3579_v16 = vpop.f32.mrb[24].mxu1 }
0x18ce   :  { %v2863_v19 = vpop.f32.mrb[25].mxu1  ;;  %3050 = vrot.lane.b32.xlu0 %v3579_v16, %s4023_s17 }
0x18cf   :  { %2972 = vrot.lane.b32.xlu1 %v2863_v19, %s4023_s17  ;;  %3590 = vmatprep.mubr.msk.f32.mxu1 %vm2888_vm8, %v2863_v19 }
0x18d0   :  { %3591 = vmatmul.mubr.msk.f32.vlgmr.msra.gmra.mrb[26].mxu1 %vm2888_vm8, %v3579_v16 }
0x18d1   :  { %3600 = vmatprep.mubr.msk.f32.mxu1 %vm4025_vm14, %v4020_v28 }
0x18d2   :  { %2876 = vrot.lane.b32.xlu0 %v3579_v16, %s4024_s18 }
0x18d3   :  { %2874 = vrot.lane.b32.xlu1 %v2863_v19, %s4024_s18 }
0x1940   :  { %v3051_v20 = vpop.permute.xlu0 %3050 }
0x1941   :  { %v2973_v22 = vpop.permute.xlu1 %2972  ;;  %3599 = vmatpush3.xpose.msk.msra.mxu1 %vm2888_vm8, %v3051_v20 }
0x1942   :  { %3594 = vmatpush3.xpose.msk.msra.mxu0 %vm2888_vm8, %v2973_v22 }
0x1944   :  { %v2877_v23 = vpop.permute.xlu0 %2876 }
0x1945   :  { %2882 = vst.msk [vmem:[%s4728_s3 + $0x8] sm:$0xff] %vm2880_vm9, %v2877_v23  ;;  %v2875_v25 = vpop.permute.xlu1 %2874 }
0x1946   :  { %2881 = vst.msk [vmem:[%s4728_s3] sm:$0xff] %vm2880_vm9, %v2875_v25 }
0x19a3   :  { %v3592_v26 = vpop.f32.mrb[26].mxu1 }
0x19a4   :  { %v2963_v18 = vpop.f32.mrb[27].mxu1  ;;  %3601 = vmatmul.mubr.msk.f32.vlgmr.msra.gmra.mrb[28].mxu1 %vm2888_vm8, %v3592_v26 }
0x19a5   :  { %3596 = vmatmul.mubr.msk.f32.vlgmr.msra.gmra.mrb[26].mxu0 %vm2888_vm8, %v2963_v18 }
0x1a77   :  { %v3123_v28 = vpop.f32.mrb[28].mxu1 }
0x1a78   :  { %v3045_v4 = vpop.f32.mrb[26].mxu0  ;;  %3127 = vst.msk [vmem:[%s4728_s3 + $0x8] sm:$0xff] %vm32_vm0, %v3123_v28  ;;  %v3602_v21 = vpop.f32.mrb[29].mxu1 }
0x1a79   :  { %3049 = vst.msk [vmem:[%s4728_s3] sm:$0xff] %vm32_vm0, %v3045_v4  ;;  %v3597_v24 = vpop.f32.mrb[27].mxu0 }

</bundles_post_ra>
